<compile_context>
chip_gen: v7x
topology: tpu7x:2x2x1
jax: 0.10.0
libtpu: 0.0.40
codegen_flags: <defaults>
</compile_context>

<pallas_src>
import functools

import jax
import jax.numpy as jnp
from jax.experimental import pallas as pl
from jax.experimental.pallas import tpu as pltpu


# --------------------------------------------------------------------------
# Kernel
# --------------------------------------------------------------------------
def dae_kernel(emb_ref, wcp_ref, bcp_ref, w1_ref, b1_ref, w2_ref, b2_ref,
               *out_refs, hh, split_in_kernel):
    # emb is already in the compute dtype (cast in the wrapper, not in-kernel).
    x = emb_ref[...]

    # Fused encoder: Wcp = [Wc | Wp]  ->  enc = [common | private]; f32 accum,
    # f32 bias add (VPU path stays f32 so v5e's lack of bf16 VPU is moot).
    enc = jnp.dot(x, wcp_ref[...], preferred_element_type=jnp.float32) + bcp_ref[...]

    # Decoder: enc is already cat((common, private), 1) in the right order.
    h = jnp.dot(enc.astype(x.dtype), w1_ref[...],
                preferred_element_type=jnp.float32) + b1_ref[...]
    h = jnp.maximum(h, 0.0)                       # ReLU kept in f32
    recons = jnp.dot(h.astype(x.dtype), w2_ref[...],
                     preferred_element_type=jnp.float32) + b2_ref[...]

    if split_in_kernel:
        # Hh is a multiple of 128 -> these stores stay lane-dense.
        common_ref, private_ref, recons_ref = out_refs
        common_ref[...] = enc[:, :hh].astype(common_ref.dtype)
        private_ref[...] = enc[:, hh:].astype(private_ref.dtype)
    else:
        # Emit one fused, lane-dense enc slab; the wrapper splits it outside.
        enc_ref, recons_ref = out_refs
        enc_ref[...] = enc.astype(enc_ref.dtype)
    recons_ref[...] = recons.astype(recons_ref.dtype)


# --------------------------------------------------------------------------
# Wrapper helpers
# --------------------------------------------------------------------------
def _round_up(x, m):
    return ((x + m - 1) // m) * m


def _hw_info():
    """(VMEM capacity bytes, chip has >1 TensorCore), with safe fallbacks."""
    vmem = 128 << 20
    try:
        vmem = int(pltpu.get_tpu_info().vmem_capacity_bytes)
    except Exception:
        pass
    multi_tc = False
    try:
        kind = jax.devices()[0].device_kind.lower()
        multi_tc = ("v7" in kind) or ("v4" in kind) or ("v5p" in kind)
    except Exception:
        pass
    return vmem, multi_tc


def _pick_tb(B, multi_tc):
    """Batch tile: >=2 grid steps on multi-TC chips, one maximal tile otherwise."""
    if multi_tc:
        if B >= 512:
            return 256
        if B >= 16:
            # Guarantee >= 2 grid steps so both TensorCores get work.
            return min(256, _round_up(pl.cdiv(B, 2), 8))
        return B
    # Single TC (v5e/v6e): the grid is a sequential loop -> fewer, bigger steps
    # amortize the ~0.35 us/step pipeline overhead.
    return min(B, 512)


def _vmem_estimate(tb, H, cbytes, obytes, weight_buffers):
    """Rough per-kernel VMEM footprint in bytes."""
    return (2 * tb * H * cbytes                        # emb tile (double-buffered)
            + 2 * 2 * tb * H * obytes                  # output tiles (enc|c+p, recons)
            + weight_buffers * 3 * H * H * cbytes      # Wcp, W1, W2
            + 2 * 3 * H * 4                            # f32 biases
            + 3 * tb * H * 4)                          # f32 intermediates enc/h/recons


# --------------------------------------------------------------------------
# Forward
# --------------------------------------------------------------------------
def dae_forward(emb, params, *, tb=None, compute_dtype=jnp.bfloat16, out_dtype=None):
    """DAE forward.  emb: [B, hidden] float32.  Returns (common, private, recons)."""
    B, H = emb.shape
    Hh = H // 2
    wc, bc, wp, bp, w1, b1, w2, b2 = params
    out_dtype = emb.dtype if out_dtype is None else jnp.dtype(out_dtype)

    vmem_cap, multi_tc = _hw_info()
    cbytes = jnp.dtype(compute_dtype).itemsize
    obytes = jnp.dtype(out_dtype).itemsize

    if tb is None:
        tb = _pick_tb(B, multi_tc)
    tb = min(tb, B)
    # Shrink the tile if the footprint would blow this generation's VMEM.
    while tb > 64 and _vmem_estimate(tb, H, cbytes, obytes, 2) > int(vmem_cap * 0.6):
        tb = max(64, tb // 2)
    # TODO(synk): for H large enough that 3*H^2 weights exceed ~half of VMEM
    # (H ~ 2.3k bf16 on v7x), add a fallback that tiles W1/W2 over their N axis.
    # TODO(synk): optional fp8 weights (per-column scales in the f32 epilogue)
    # for weight-DMA-dominated shapes on v7x.

    # Fuse the two encoder Linears into one [H, H] matmul (done once, in the
    # wrapper).  Column order matches torch.cat((common, private), 1).
    wcp = jnp.concatenate([wc, wp], axis=1).astype(compute_dtype)   # [H, H]
    bcp = jnp.concatenate([bc, bp], axis=1)                         # [1, H] f32
    w1_c = w1.astype(compute_dtype)
    w2_c = w2.astype(compute_dtype)
    emb_c = emb.astype(compute_dtype)     # halves the emb HBM read in bf16 mode

    split_in_kernel = (Hh % 128 == 0)     # lane-dense common/private stores
    grid = (pl.cdiv(B, tb),)

    def build(weight_mode, weight_buffers):
        def batch_spec(cols):
            return pl.BlockSpec((tb, cols), lambda i: (i, 0))

        def whole_spec(shape):
            # Weight/bias block index never changes across the grid; with
            # Buffered(1) Pallas keeps a single resident copy (DMA'd once).
            if weight_mode is None:
                return pl.BlockSpec(shape, lambda i: (0, 0))
            return pl.BlockSpec(shape, lambda i: (0, 0), pipeline_mode=weight_mode)

        if split_in_kernel:
            out_shapes = (
                jax.ShapeDtypeStruct((B, Hh), out_dtype),   # common
                jax.ShapeDtypeStruct((B, Hh), out_dtype),   # private
                jax.ShapeDtypeStruct((B, H), out_dtype),    # recons
            )
            out_specs = [batch_spec(Hh), batch_spec(Hh), batch_spec(H)]
        else:
            out_shapes = (
                jax.ShapeDtypeStruct((B, H), out_dtype),    # fused enc = [common|private]
                jax.ShapeDtypeStruct((B, H), out_dtype),    # recons
            )
            out_specs = [batch_spec(H), batch_spec(H)]

        est = _vmem_estimate(tb, H, cbytes, obytes, weight_buffers)
        vmem_limit = None
        if est > (16 << 20):
            vmem_limit = min(int(est * 3 // 2) + (4 << 20), vmem_cap - (8 << 20))

        kernel = functools.partial(dae_kernel, hh=Hh, split_in_kernel=split_in_kernel)
        return pl.pallas_call(
            kernel,
            out_shape=out_shapes,
            grid_spec=pltpu.PrefetchScalarGridSpec(
                num_scalar_prefetch=0,
                grid=grid,
                in_specs=[
                    batch_spec(H),            # emb tile (compute dtype)
                    whole_spec((H, H)),       # Wcp (fused encoder weight)
                    whole_spec((1, H)),       # bcp (fused encoder bias, f32)
                    whole_spec((H, H)),       # W1
                    whole_spec((1, H)),       # b1
                    whole_spec((H, H)),       # W2
                    whole_spec((1, H)),       # b2
                ],
                out_specs=out_specs,
            ),
            compiler_params=pltpu.CompilerParams(
                dimension_semantics=("parallel",),
                vmem_limit_bytes=vmem_limit),
        )

    args = (emb_c, wcp, bcp, w1_c, b1, w2_c, b2)
    try:
        outs = build(pl.Buffered(1), 1)(*args)     # single-buffered resident weights
    except Exception:
        outs = build(None, 2)(*args)               # fallback: default buffering

    if split_in_kernel:
        common, private, recons = outs
    else:
        enc, recons = outs
        common, private = enc[:, :Hh], enc[:, Hh:]
    return common, private, recons


# --------------------------------------------------------------------------
# Parameters / reference
# --------------------------------------------------------------------------
def init_params(key, hidden):
    """Deterministic synthetic parameters matching the PyTorch module shapes.

    PyTorch Linear(in, out) has weight [out, in]; we create them that way and
    transpose to [in, out] for the kernel.
    """
    Hh = hidden // 2
    ks = jax.random.split(key, 8)

    def lin(kw, kb, fan_in, fan_out):
        bound = 1.0 / jnp.sqrt(fan_in)
        w = jax.random.uniform(kw, (fan_out, fan_in), jnp.float32, -bound, bound)
        b = jax.random.uniform(kb, (fan_out,), jnp.float32, -bound, bound)
        return w.T, b.reshape(1, fan_out)   # [in, out], [1, out]

    wc, bc = lin(ks[0], ks[1], hidden, Hh)      # encoder.C
    wp, bp = lin(ks[2], ks[3], hidden, Hh)      # encoder.P
    w1, b1 = lin(ks[4], ks[5], hidden, hidden)  # decoder.linear1
    w2, b2 = lin(ks[6], ks[7], hidden, hidden)  # decoder.linear2
    return (wc, bc, wp, bp, w1, b1, w2, b2)


def dae_reference(emb, params):
    wc, bc, wp, bp, w1, b1, w2, b2 = params
    common = emb @ wc + bc
    private = emb @ wp + bp
    cat = jnp.concatenate([common, private], axis=1)
    h = jnp.maximum(cat @ w1 + b1, 0.0)
    recons = h @ w2 + b2
    return common, private, recons


def _check(key, batch, hidden, tb=None):
    k_emb, k_par = jax.random.split(key)
    emb = jax.random.normal(k_emb, (batch, hidden), jnp.float32)
    params = init_params(k_par, hidden)
    ref_c, ref_p, ref_r = dae_reference(emb, params)

    # f32 MXU path (exact-ish) — tight tolerance.
    c, p, r = jax.block_until_ready(
        dae_forward(emb, params, tb=tb, compute_dtype=jnp.float32))
    assert jnp.allclose(c, ref_c, atol=1e-5, rtol=1e-5)
    assert jnp.allclose(p, ref_p, atol=1e-5, rtol=1e-5)
    assert jnp.allclose(r, ref_r, atol=1e-5, rtol=1e-5)

    # Default bf16 fast path (bf16 emb/weights, f32 accum/bias/ReLU) — relaxed.
    c16, p16, r16 = jax.block_until_ready(dae_forward(emb, params, tb=tb))
    assert jnp.allclose(c16, ref_c, atol=1e-1, rtol=5e-2)
    assert jnp.allclose(p16, ref_p, atol=1e-1, rtol=5e-2)
    assert jnp.allclose(r16, ref_r, atol=1e-1, rtol=5e-2)


if __name__ == "__main__":
    key = jax.random.PRNGKey(0)
    k0, k1, k2 = jax.random.split(key, 3)

    _check(k0, batch=16, hidden=256)           # Hh % 128 == 0: in-kernel split
    _check(k1, batch=10, hidden=192)           # Hh = 96: fused enc out, split outside
    _check(k2, batch=20, hidden=256, tb=16)    # ragged last batch block

    print("KERNEL_OK")
</pallas_src>

<mosaic_0001>
module attributes {stable_mosaic.version = 11 : i64} {
  func.func @dae_kernel(%arg0: i32, %arg1: memref<16x256xf32, #tpu.memory_space<vmem>>, %arg2: memref<256x256xf32, #tpu.memory_space<vmem>>, %arg3: memref<1x256xf32, #tpu.memory_space<vmem>>, %arg4: memref<256x256xf32, #tpu.memory_space<vmem>>, %arg5: memref<1x256xf32, #tpu.memory_space<vmem>>, %arg6: memref<256x256xf32, #tpu.memory_space<vmem>>, %arg7: memref<1x256xf32, #tpu.memory_space<vmem>>, %arg8: memref<16x128xf32, #tpu.memory_space<vmem>>, %arg9: memref<16x128xf32, #tpu.memory_space<vmem>>, %arg10: memref<16x256xf32, #tpu.memory_space<vmem>>) attributes {dimension_semantics = [#tpu.dimension_semantics<parallel>], iteration_bounds = array<i64: 1>, scalar_prefetch = 0 : i64, scratch_operands = 0 : i64, tpu.core_type = #tpu.core_type<tc>, window_params = [{transform_indices = @transform_0, window_bounds = array<i64: 16, 256>}, {pipeline_mode = #tpu.pipeline_mode<synchronous>, transform_indices = @transform_1, window_bounds = array<i64: 256, 256>}, {pipeline_mode = #tpu.pipeline_mode<synchronous>, transform_indices = @transform_2, window_bounds = array<i64: 1, 256>}, {pipeline_mode = #tpu.pipeline_mode<synchronous>, transform_indices = @transform_3, window_bounds = array<i64: 256, 256>}, {pipeline_mode = #tpu.pipeline_mode<synchronous>, transform_indices = @transform_4, window_bounds = array<i64: 1, 256>}, {pipeline_mode = #tpu.pipeline_mode<synchronous>, transform_indices = @transform_5, window_bounds = array<i64: 256, 256>}, {pipeline_mode = #tpu.pipeline_mode<synchronous>, transform_indices = @transform_6, window_bounds = array<i64: 1, 256>}, {transform_indices = @transform_7, window_bounds = array<i64: 16, 128>}, {transform_indices = @transform_8, window_bounds = array<i64: 16, 128>}, {transform_indices = @transform_9, window_bounds = array<i64: 16, 256>}]} {
    %c0 = arith.constant 0 : index
    %c0_0 = arith.constant 0 : index
    %0 = vector.load %arg1[%c0, %c0_0] : memref<16x256xf32, #tpu.memory_space<vmem>>, vector<16x256xf32>
    %c0_1 = arith.constant 0 : index
    %c0_2 = arith.constant 0 : index
    %1 = vector.load %arg2[%c0_1, %c0_2] : memref<256x256xf32, #tpu.memory_space<vmem>>, vector<256x256xf32>
    %cst = arith.constant dense<0.000000e+00> : vector<16x256xf32>
    %2 = tpu.matmul %0, %1, %cst {dimension_numbers = #tpu.dot_dimension_numbers<[1], [0], [0], [1], [0, 0, 1, 1], [], []>} : vector<16x256xf32>, vector<256x256xf32>, vector<16x256xf32> -> vector<16x256xf32>
    %c0_3 = arith.constant 0 : index
    %c0_4 = arith.constant 0 : index
    %3 = vector.load %arg3[%c0_3, %c0_4] : memref<1x256xf32, #tpu.memory_space<vmem>>, vector<1x256xf32>
    %4 = vector.broadcast %3 : vector<1x256xf32> to vector<16x256xf32>
    %5 = arith.addf %2, %4 : vector<16x256xf32>
    %c0_5 = arith.constant 0 : index
    %c0_6 = arith.constant 0 : index
    %6 = vector.load %arg4[%c0_5, %c0_6] : memref<256x256xf32, #tpu.memory_space<vmem>>, vector<256x256xf32>
    %cst_7 = arith.constant dense<0.000000e+00> : vector<16x256xf32>
    %7 = tpu.matmul %5, %6, %cst_7 {dimension_numbers = #tpu.dot_dimension_numbers<[1], [0], [0], [1], [0, 0, 1, 1], [], []>} : vector<16x256xf32>, vector<256x256xf32>, vector<16x256xf32> -> vector<16x256xf32>
    %c0_8 = arith.constant 0 : index
    %c0_9 = arith.constant 0 : index
    %8 = vector.load %arg5[%c0_8, %c0_9] : memref<1x256xf32, #tpu.memory_space<vmem>>, vector<1x256xf32>
    %9 = vector.broadcast %8 : vector<1x256xf32> to vector<16x256xf32>
    %10 = arith.addf %7, %9 : vector<16x256xf32>
    %cst_10 = arith.constant 0.000000e+00 : f32
    %11 = vector.broadcast %cst_10 : f32 to vector<16x256xf32>
    %12 = arith.maximumf %10, %11 : vector<16x256xf32>
    %c0_11 = arith.constant 0 : index
    %c0_12 = arith.constant 0 : index
    %13 = vector.load %arg6[%c0_11, %c0_12] : memref<256x256xf32, #tpu.memory_space<vmem>>, vector<256x256xf32>
    %cst_13 = arith.constant dense<0.000000e+00> : vector<16x256xf32>
    %14 = tpu.matmul %12, %13, %cst_13 {dimension_numbers = #tpu.dot_dimension_numbers<[1], [0], [0], [1], [0, 0, 1, 1], [], []>} : vector<16x256xf32>, vector<256x256xf32>, vector<16x256xf32> -> vector<16x256xf32>
    %c0_14 = arith.constant 0 : index
    %c0_15 = arith.constant 0 : index
    %15 = vector.load %arg7[%c0_14, %c0_15] : memref<1x256xf32, #tpu.memory_space<vmem>>, vector<1x256xf32>
    %16 = vector.broadcast %15 : vector<1x256xf32> to vector<16x256xf32>
    %17 = arith.addf %14, %16 : vector<16x256xf32>
    %18 = vector.extract_strided_slice %5 {offsets = [0, 0], sizes = [16, 128], strides = [1, 1]} : vector<16x256xf32> to vector<16x128xf32>
    %c0_16 = arith.constant 0 : index
    %c0_17 = arith.constant 0 : index
    %19 = vector.load %arg8[%c0_16, %c0_17] : memref<16x128xf32, #tpu.memory_space<vmem>>, vector<16x128xf32>
    tpu.vector_store %arg8[%c0_16, %c0_17], %18 {strides = array<i32>} : memref<16x128xf32, #tpu.memory_space<vmem>>, vector<16x128xf32>,
    %20 = vector.extract_strided_slice %5 {offsets = [0, 128], sizes = [16, 128], strides = [1, 1]} : vector<16x256xf32> to vector<16x128xf32>
    %c0_18 = arith.constant 0 : index
    %c0_19 = arith.constant 0 : index
    %21 = vector.load %arg9[%c0_18, %c0_19] : memref<16x128xf32, #tpu.memory_space<vmem>>, vector<16x128xf32>
    tpu.vector_store %arg9[%c0_18, %c0_19], %20 {strides = array<i32>} : memref<16x128xf32, #tpu.memory_space<vmem>>, vector<16x128xf32>,
    %c0_20 = arith.constant 0 : index
    %c0_21 = arith.constant 0 : index
    %22 = vector.load %arg10[%c0_20, %c0_21] : memref<16x256xf32, #tpu.memory_space<vmem>>, vector<16x256xf32>
    tpu.vector_store %arg10[%c0_20, %c0_21], %17 {strides = array<i32>} : memref<16x256xf32, #tpu.memory_space<vmem>>, vector<16x256xf32>,
    return
  }
  func.func @transform_0(%arg0: i32) -> (i32, i32) {
    %c0_i32 = arith.constant 0 : i32
    %c0_i32_0 = arith.constant 0 : i32
    return %arg0, %c0_i32 : i32, i32
  }
  func.func @transform_1(%arg0: i32) -> (i32, i32) {
    %c0_i32 = arith.constant 0 : i32
    %c0_i32_0 = arith.constant 0 : i32
    %c0_i32_1 = arith.constant 0 : i32
    return %c0_i32, %c0_i32_0 : i32, i32
  }
  func.func @transform_2(%arg0: i32) -> (i32, i32) {
    %c0_i32 = arith.constant 0 : i32
    %c0_i32_0 = arith.constant 0 : i32
    %c0_i32_1 = arith.constant 0 : i32
    return %c0_i32, %c0_i32_0 : i32, i32
  }
  func.func @transform_3(%arg0: i32) -> (i32, i32) {
    %c0_i32 = arith.constant 0 : i32
    %c0_i32_0 = arith.constant 0 : i32
    %c0_i32_1 = arith.constant 0 : i32
    return %c0_i32, %c0_i32_0 : i32, i32
  }
  func.func @transform_4(%arg0: i32) -> (i32, i32) {
    %c0_i32 = arith.constant 0 : i32
    %c0_i32_0 = arith.constant 0 : i32
    %c0_i32_1 = arith.constant 0 : i32
    return %c0_i32, %c0_i32_0 : i32, i32
  }
  func.func @transform_5(%arg0: i32) -> (i32, i32) {
    %c0_i32 = arith.constant 0 : i32
    %c0_i32_0 = arith.constant 0 : i32
    %c0_i32_1 = arith.constant 0 : i32
    return %c0_i32, %c0_i32_0 : i32, i32
  }
  func.func @transform_6(%arg0: i32) -> (i32, i32) {
    %c0_i32 = arith.constant 0 : i32
    %c0_i32_0 = arith.constant 0 : i32
    %c0_i32_1 = arith.constant 0 : i32
    return %c0_i32, %c0_i32_0 : i32, i32
  }
  func.func @transform_7(%arg0: i32) -> (i32, i32) {
    %c0_i32 = arith.constant 0 : i32
    %c0_i32_0 = arith.constant 0 : i32
    return %arg0, %c0_i32 : i32, i32
  }
  func.func @transform_8(%arg0: i32) -> (i32, i32) {
    %c0_i32 = arith.constant 0 : i32
    %c0_i32_0 = arith.constant 0 : i32
    return %arg0, %c0_i32 : i32, i32
  }
  func.func @transform_9(%arg0: i32) -> (i32, i32) {
    %c0_i32 = arith.constant 0 : i32
    %c0_i32_0 = arith.constant 0 : i32
    return %arg0, %c0_i32 : i32, i32
  }
}

module attributes {stable_mosaic.version = 11 : i64} {
  func.func @dae_kernel(%arg0: i32, %arg1: memref<16x256xf32, #tpu.memory_space<vmem>>, %arg2: memref<256x256xf32, #tpu.memory_space<vmem>>, %arg3: memref<1x256xf32, #tpu.memory_space<vmem>>, %arg4: memref<256x256xf32, #tpu.memory_space<vmem>>, %arg5: memref<1x256xf32, #tpu.memory_space<vmem>>, %arg6: memref<256x256xf32, #tpu.memory_space<vmem>>, %arg7: memref<1x256xf32, #tpu.memory_space<vmem>>, %arg8: memref<16x128xf32, #tpu.memory_space<vmem>>, %arg9: memref<16x128xf32, #tpu.memory_space<vmem>>, %arg10: memref<16x256xf32, #tpu.memory_space<vmem>>) attributes {dimension_semantics = [#tpu.dimension_semantics<parallel>], iteration_bounds = array<i64: 1>, scalar_prefetch = 0 : i64, scratch_operands = 0 : i64, tpu.core_type = #tpu.core_type<tc>, window_params = [{transform_indices = @transform_0, window_bounds = array<i64: 16, 256>}, {pipeline_mode = #tpu.pipeline_mode<synchronous>, transform_indices = @transform_1, window_bounds = array<i64: 256, 256>}, {pipeline_mode = #tpu.pipeline_mode<synchronous>, transform_indices = @transform_2, window_bounds = array<i64: 1, 256>}, {pipeline_mode = #tpu.pipeline_mode<synchronous>, transform_indices = @transform_3, window_bounds = array<i64: 256, 256>}, {pipeline_mode = #tpu.pipeline_mode<synchronous>, transform_indices = @transform_4, window_bounds = array<i64: 1, 256>}, {pipeline_mode = #tpu.pipeline_mode<synchronous>, transform_indices = @transform_5, window_bounds = array<i64: 256, 256>}, {pipeline_mode = #tpu.pipeline_mode<synchronous>, transform_indices = @transform_6, window_bounds = array<i64: 1, 256>}, {transform_indices = @transform_7, window_bounds = array<i64: 16, 128>}, {transform_indices = @transform_8, window_bounds = array<i64: 16, 128>}, {transform_indices = @transform_9, window_bounds = array<i64: 16, 256>}]} {
    %c0 = arith.constant 0 : index
    %c0_0 = arith.constant 0 : index
    %0 = vector.load %arg1[%c0, %c0_0] : memref<16x256xf32, #tpu.memory_space<vmem>>, vector<16x256xf32>
    %c0_1 = arith.constant 0 : index
    %c0_2 = arith.constant 0 : index
    %1 = vector.load %arg2[%c0_1, %c0_2] : memref<256x256xf32, #tpu.memory_space<vmem>>, vector<256x256xf32>
    %cst = arith.constant dense<0.000000e+00> : vector<16x256xf32>
    %2 = tpu.matmul %0, %1, %cst {dimension_numbers = #tpu.dot_dimension_numbers<[1], [0], [0], [1], [0, 0, 1, 1], [], []>} : vector<16x256xf32>, vector<256x256xf32>, vector<16x256xf32> -> vector<16x256xf32>
    %c0_3 = arith.constant 0 : index
    %c0_4 = arith.constant 0 : index
    %3 = vector.load %arg3[%c0_3, %c0_4] : memref<1x256xf32, #tpu.memory_space<vmem>>, vector<1x256xf32>
    %4 = vector.broadcast %3 : vector<1x256xf32> to vector<16x256xf32>
    %5 = arith.addf %2, %4 : vector<16x256xf32>
    %c0_5 = arith.constant 0 : index
    %c0_6 = arith.constant 0 : index
    %6 = vector.load %arg4[%c0_5, %c0_6] : memref<256x256xf32, #tpu.memory_space<vmem>>, vector<256x256xf32>
    %cst_7 = arith.constant dense<0.000000e+00> : vector<16x256xf32>
    %7 = tpu.matmul %5, %6, %cst_7 {dimension_numbers = #tpu.dot_dimension_numbers<[1], [0], [0], [1], [0, 0, 1, 1], [], []>} : vector<16x256xf32>, vector<256x256xf32>, vector<16x256xf32> -> vector<16x256xf32>
    %c0_8 = arith.constant 0 : index
    %c0_9 = arith.constant 0 : index
    %8 = vector.load %arg5[%c0_8, %c0_9] : memref<1x256xf32, #tpu.memory_space<vmem>>, vector<1x256xf32>
    %9 = vector.broadcast %8 : vector<1x256xf32> to vector<16x256xf32>
    %10 = arith.addf %7, %9 : vector<16x256xf32>
    %cst_10 = arith.constant 0.000000e+00 : f32
    %11 = vector.broadcast %cst_10 : f32 to vector<16x256xf32>
    %12 = arith.maximumf %10, %11 : vector<16x256xf32>
    %c0_11 = arith.constant 0 : index
    %c0_12 = arith.constant 0 : index
    %13 = vector.load %arg6[%c0_11, %c0_12] : memref<256x256xf32, #tpu.memory_space<vmem>>, vector<256x256xf32>
    %cst_13 = arith.constant dense<0.000000e+00> : vector<16x256xf32>
    %14 = tpu.matmul %12, %13, %cst_13 {dimension_numbers = #tpu.dot_dimension_numbers<[1], [0], [0], [1], [0, 0, 1, 1], [], []>} : vector<16x256xf32>, vector<256x256xf32>, vector<16x256xf32> -> vector<16x256xf32>
    %c0_14 = arith.constant 0 : index
    %c0_15 = arith.constant 0 : index
    %15 = vector.load %arg7[%c0_14, %c0_15] : memref<1x256xf32, #tpu.memory_space<vmem>>, vector<1x256xf32>
    %16 = vector.broadcast %15 : vector<1x256xf32> to vector<16x256xf32>
    %17 = arith.addf %14, %16 : vector<16x256xf32>
    %18 = vector.extract_strided_slice %5 {offsets = [0, 0], sizes = [16, 128], strides = [1, 1]} : vector<16x256xf32> to vector<16x128xf32>
    %c0_16 = arith.constant 0 : index
    %c0_17 = arith.constant 0 : index
    %19 = vector.load %arg8[%c0_16, %c0_17] : memref<16x128xf32, #tpu.memory_space<vmem>>, vector<16x128xf32>
    tpu.vector_store %arg8[%c0_16, %c0_17], %18 {strides = array<i32>} : memref<16x128xf32, #tpu.memory_space<vmem>>, vector<16x128xf32>,
    %20 = vector.extract_strided_slice %5 {offsets = [0, 128], sizes = [16, 128], strides = [1, 1]} : vector<16x256xf32> to vector<16x128xf32>
    %c0_18 = arith.constant 0 : index
    %c0_19 = arith.constant 0 : index
    %21 = vector.load %arg9[%c0_18, %c0_19] : memref<16x128xf32, #tpu.memory_space<vmem>>, vector<16x128xf32>
    tpu.vector_store %arg9[%c0_18, %c0_19], %20 {strides = array<i32>} : memref<16x128xf32, #tpu.memory_space<vmem>>, vector<16x128xf32>,
    %c0_20 = arith.constant 0 : index
    %c0_21 = arith.constant 0 : index
    %22 = vector.load %arg10[%c0_20, %c0_21] : memref<16x256xf32, #tpu.memory_space<vmem>>, vector<16x256xf32>
    tpu.vector_store %arg10[%c0_20, %c0_21], %17 {strides = array<i32>} : memref<16x256xf32, #tpu.memory_space<vmem>>, vector<16x256xf32>,
    return
  }
  func.func @transform_0(%arg0: i32) -> (i32, i32) {
    %c0_i32 = arith.constant 0 : i32
    %c0_i32_0 = arith.constant 0 : i32
    return %arg0, %c0_i32 : i32, i32
  }
  func.func @transform_1(%arg0: i32) -> (i32, i32) {
    %c0_i32 = arith.constant 0 : i32
    %c0_i32_0 = arith.constant 0 : i32
    %c0_i32_1 = arith.constant 0 : i32
    return %c0_i32, %c0_i32_0 : i32, i32
  }
  func.func @transform_2(%arg0: i32) -> (i32, i32) {
    %c0_i32 = arith.constant 0 : i32
    %c0_i32_0 = arith.constant 0 : i32
    %c0_i32_1 = arith.constant 0 : i32
    return %c0_i32, %c0_i32_0 : i32, i32
  }
  func.func @transform_3(%arg0: i32) -> (i32, i32) {
    %c0_i32 = arith.constant 0 : i32
    %c0_i32_0 = arith.constant 0 : i32
    %c0_i32_1 = arith.constant 0 : i32
    return %c0_i32, %c0_i32_0 : i32, i32
  }
  func.func @transform_4(%arg0: i32) -> (i32, i32) {
    %c0_i32 = arith.constant 0 : i32
    %c0_i32_0 = arith.constant 0 : i32
    %c0_i32_1 = arith.constant 0 : i32
    return %c0_i32, %c0_i32_0 : i32, i32
  }
  func.func @transform_5(%arg0: i32) -> (i32, i32) {
    %c0_i32 = arith.constant 0 : i32
    %c0_i32_0 = arith.constant 0 : i32
    %c0_i32_1 = arith.constant 0 : i32
    return %c0_i32, %c0_i32_0 : i32, i32
  }
  func.func @transform_6(%arg0: i32) -> (i32, i32) {
    %c0_i32 = arith.constant 0 : i32
    %c0_i32_0 = arith.constant 0 : i32
    %c0_i32_1 = arith.constant 0 : i32
    return %c0_i32, %c0_i32_0 : i32, i32
  }
  func.func @transform_7(%arg0: i32) -> (i32, i32) {
    %c0_i32 = arith.constant 0 : i32
    %c0_i32_0 = arith.constant 0 : i32
    return %arg0, %c0_i32 : i32, i32
  }
  func.func @transform_8(%arg0: i32) -> (i32, i32) {
    %c0_i32 = arith.constant 0 : i32
    %c0_i32_0 = arith.constant 0 : i32
    return %arg0, %c0_i32 : i32, i32
  }
  func.func @transform_9(%arg0: i32) -> (i32, i32) {
    %c0_i32 = arith.constant 0 : i32
    %c0_i32_0 = arith.constant 0 : i32
    return %arg0, %c0_i32 : i32, i32
  }
}

</mosaic_0001>

<bundles_post_ra>
// kernel: tpu_custom_call.1
= control target key start
LH: loop header
LB: loop body
LE: loop exit
PB: predicated region body
PF: predicated region fallthrough
CT: control target
= control target key end

     0   :  { %15 = vsyncpa [#allocation3], 0  ;;  %s1299_s0 = inlined_call_operand.hbm [shape: f32[16,256], index: 0, kind: input, shape index: {}]   ;;  %s1300_s1 = inlined_call_operand.hbm [shape: f32[256,256], index: 1, kind: input, shape index: {}]   ;;  %s1301_s2 = inlined_call_operand.vmem [shape: f32[1,256], index: 2, kind: input, shape index: {}]   ;;  %s1302_s3 = inlined_call_operand.hbm [shape: f32[256,256], index: 3, kind: input, shape index: {}]   ;;  %s1303_s4 = inlined_call_operand.vmem [shape: f32[1,256], index: 4, kind: input, shape index: {}]   ;;  %s1304_s5 = inlined_call_operand.hbm [shape: f32[256,256], index: 5, kind: input, shape index: {}]   ;;  %s1305_s6 = inlined_call_operand.vmem [shape: f32[1,256], index: 6, kind: input, shape index: {}]   ;;  %s1306_s7 = inlined_call_operand.hbm [shape: f32[16,128], index: 7, kind: output, shape index: {0}]   ;;  %s1307_s8 = inlined_call_operand.hbm [shape: f32[16,128], index: 8, kind: output, shape index: {1}]   ;;  %s1308_s9 = inlined_call_operand.hbm [shape: f32[16,256], index: 9, kind: output, shape index: {2}]  }
   0x1   :  { %16 = vsyncpa [#allocation6], 0 }
   0x2   :  { %17 = vsyncpa [#allocation9], 0 }
   0x3   :  { %18 = vsyncpa [#allocation4], 0 }
   0x4   :  { %19 = vsyncpa [#allocation12], 0  ;;  %s1010_s30 = smov [#allocation5]   ;;  %s1011_s11 = smov [#allocation2]  }
   0x5   :  { %s37_s10 = sshll.u32 %s1010_s30, 4  ;;  %s25_s12 = sshll.u32 %s1011_s11, 4  ;;  %s38_s10 = int_to_ptr.vmem [resolvable:$true] %s37_s10  ;;  %s1071_s12 = int_to_ptr.vmem [resolvable:$true] %s25_s12 }
   0x6   :  { %s846_s15 = scalar_lea.hbm %s1300_s1, 8192 }
   0x7   :  { %p847_p0 = scmp.ne.s32.totalorder %s1300_s1, %s846_s15  ;;  %p850_p1 = scmp.lt.u32.totalorder %s846_s15, %s1300_s1 }
   0x9   :  { %p852_p2 = pnand %p850_p1, %p847_p0 }
   0xb   :  { %855 = shalt.err (!%p852_p2)
}
   0xc   :  { %s856_s20 = scalar_lea.vmem %s38_s10, 8192  ;;  %p861_p4 = scmp.lt.s32.totalorder %s38_s10, %s38_s10 }
   0xd   :  { %p857_p3 = scmp.ne.s32.totalorder %s38_s10, %s856_s20  ;;  %p862_p5 = scmp.lt.s32.totalorder %s856_s20, %s856_s20 }
   0xf   :  { %p863_p6 = por %p862_p5, %p861_p4 }
  0x11   :  { %p864_p7 = pnand %p863_p6, %p857_p3 }
  0x13   :  { %867 = shalt.err (!%p864_p7)
}
  0x14   :  { %s1012_s21 = smov 256   ;;  %s1013_s22 = smov 16  }
  0x15   :  { %43 = dma.hbm_to_vmem [thread:$0]  %s1300_s1, 8192, %s38_s10, [#allocation6], %s1012_s21, %s1012_s21, %s1013_s22  }
  0x16   :  { %s868_s27 = scalar_lea.hbm %s1299_s0, 512 }
  0x17   :  { %p869_p8 = scmp.ne.s32.totalorder %s1299_s0, %s868_s27  ;;  %p872_p9 = scmp.lt.u32.totalorder %s868_s27, %s1299_s0 }
  0x19   :  { %p874_p10 = pnand %p872_p9, %p869_p8 }
  0x1b   :  { %877 = shalt.err (!%p874_p10)
}
  0x1c   :  { %s878_s13 = scalar_lea.vmem %s1071_s12, 512  ;;  %p883_p12 = scmp.lt.s32.totalorder %s1071_s12, %s1071_s12 }
  0x1d   :  { %p879_p11 = scmp.ne.s32.totalorder %s1071_s12, %s878_s13  ;;  %p884_p13 = scmp.lt.s32.totalorder %s878_s13, %s878_s13 }
  0x1f   :  { %p885_p0 = por %p884_p13, %p883_p12 }
  0x21   :  { %p886_p1 = pnand %p885_p0, %p879_p11 }
  0x23   :  { %889 = shalt.err (!%p886_p1)
}
  0x24   :  { %31 = dma.hbm_to_vmem [thread:$0]  %s1299_s0, 512, %s1071_s12, [#allocation3], %s1012_s21, %s1012_s21, %s1013_s22  }
  0x25   :  { %s1014_s14 = smov [#allocation7]   ;;  %s1015_s16 = smov [#allocation8]  }
  0x26   :  { %s51_s15 = sshll.u32 %s1014_s14, 4  ;;  %s65_s17 = sshll.u32 %s1015_s16, 4  ;;  %s52_s15 = int_to_ptr.vmem [resolvable:$true] %s51_s15  ;;  %s1108_s17 = int_to_ptr.vmem [resolvable:$true] %s65_s17 }
  0x27   :  { %s890_s20 = scalar_lea.hbm %s1302_s3, 8192 }
  0x28   :  { %p891_p2 = scmp.ne.s32.totalorder %s1302_s3, %s890_s20  ;;  %p894_p3 = scmp.lt.u32.totalorder %s890_s20, %s1302_s3 }
  0x2a   :  { %p896_p4 = pnand %p894_p3, %p891_p2 }
  0x2c   :  { %899 = shalt.err (!%p896_p4)
}
  0x2d   :  { %s900_s0 = scalar_lea.vmem %s52_s15, 8192  ;;  %p905_p6 = scmp.lt.s32.totalorder %s52_s15, %s52_s15 }
  0x2e   :  { %p901_p5 = scmp.ne.s32.totalorder %s52_s15, %s900_s0  ;;  %p906_p7 = scmp.lt.s32.totalorder %s900_s0, %s900_s0 }
  0x30   :  { %p907_p8 = por %p906_p7, %p905_p6 }
  0x32   :  { %p908_p9 = pnand %p907_p8, %p901_p5 }
  0x34   :  { %911 = shalt.err (!%p908_p9)
}
  0x35   :  { %57 = dma.hbm_to_vmem [thread:$0]  %s1302_s3, 8192, %s52_s15, [#allocation6], %s1012_s21, %s1012_s21, %s1013_s22  }
  0x36   :  { %s912_s30 = scalar_lea.hbm %s1304_s5, 8192 }
  0x37   :  { %p913_p10 = scmp.ne.s32.totalorder %s1304_s5, %s912_s30  ;;  %p916_p11 = scmp.lt.u32.totalorder %s912_s30, %s1304_s5 }
  0x39   :  { %p918_p12 = pnand %p916_p11, %p913_p10 }
  0x3b   :  { %921 = shalt.err (!%p918_p12)
}
  0x3c   :  { %s922_s14 = scalar_lea.vmem %s1108_s17, 8192  ;;  %p927_p0 = scmp.lt.s32.totalorder %s1108_s17, %s1108_s17 }
  0x3d   :  { %p923_p13 = scmp.ne.s32.totalorder %s1108_s17, %s922_s14  ;;  %p928_p1 = scmp.lt.s32.totalorder %s922_s14, %s922_s14 }
  0x3f   :  { %p929_p2 = por %p928_p1, %p927_p0 }
  0x41   :  { %p930_p3 = pnand %p929_p2, %p923_p13 }
  0x43   :  { %933 = shalt.err (!%p930_p3)
}
  0x44   :  { %71 = dma.hbm_to_vmem [thread:$0]  %s1304_s5, 8192, %s1108_s17, [#allocation9], %s1012_s21, %s1012_s21, %s1013_s22  }
  0x45   :  { %1000 = dma.done.wait [#allocation3], 512  }
  0x46   :  { %1001 = vsyncadd [#allocation3], 4294966784 }
  0x47   :  { %1002 = dma.done.wait [#allocation6], 16384  }
  0x48   :  { %1003 = vsyncadd [#allocation6], 4294950912 }
  0x49   :  { %1004 = dma.done.wait [#allocation9], 8192  }
  0x4a   :  { %1005 = vsyncadd [#allocation9], 4294959104  ;;  %v91_v0 = vld [vmem:[#allocation5 + $0x8] sm:$0xff]  ;;  %v93_v1 = vld [vmem:[#allocation5 + $0x18] sm:$0xff]  ;;  %s1017_s19 = smov [#allocation10]  }
  0x4b   :  { %v90_v2 = vld [vmem:[#allocation5] sm:$0xff]  ;;  %v611_v3 = vpack.c.bf16 %v93_v1, %v91_v0  ;;  %v92_v4 = vld [vmem:[#allocation5 + $0x10] sm:$0xff]  ;;  %v95_v5 = vld [vmem:[#allocation5 + $0x28] sm:$0xff]  ;;  %s566_s20 = sshll.u32 %s1017_s19, 4  ;;  %s567_s20 = int_to_ptr.vmem [resolvable:$true] %s566_s20 }
  0x4c   :  { %v97_v6 = vld [vmem:[#allocation5 + $0x38] sm:$0xff]  ;;  %v613_v7 = vpack.c.bf16 %v92_v4, %v90_v2  ;;  %v94_v9 = vld [vmem:[#allocation5 + $0x20] sm:$0xff]  ;;  %v96_v10 = vld [vmem:[#allocation5 + $0x30] sm:$0xff] }
  0x4d   :  { %v615_v8 = vpack.c.bf16 %v97_v6, %v95_v5  ;;  %v99_v11 = vld [vmem:[#allocation5 + $0x48] sm:$0xff]  ;;  %612 = vmatprep.subr.bf16.mxu0 %v611_v3  ;;  %v101_v12 = vld [vmem:[#allocation5 + $0x58] sm:$0xff]  ;;  %v617_v13 = vpack.c.bf16 %v96_v10, %v94_v9  ;;  %v98_v15 = vld [vmem:[#allocation5 + $0x40] sm:$0xff] }
  0x4e   :  { %614 = vmatpush1.bf16.msra.mxu0 %v613_v7  ;;  %v619_v14 = vpack.c.bf16 %v101_v12, %v99_v11  ;;  %v100_v16 = vld [vmem:[#allocation5 + $0x50] sm:$0xff]  ;;  %v103_v17 = vld [vmem:[#allocation5 + $0x68] sm:$0xff]  ;;  %v105_v18 = vld [vmem:[#allocation5 + $0x78] sm:$0xff] }
  0x4f   :  { %616 = vmatprep.subr.bf16.mxu0 %v615_v8  ;;  %v621_v19 = vpack.c.bf16 %v100_v16, %v98_v15  ;;  %v623_v20 = vpack.c.bf16 %v105_v18, %v103_v17  ;;  %v102_v21 = vld [vmem:[#allocation5 + $0x60] sm:$0xff]  ;;  %v104_v22 = vld [vmem:[#allocation5 + $0x70] sm:$0xff]  ;;  %v107_v23 = vld [vmem:[#allocation5 + $0x88] sm:$0xff] }
  0x50   :  { %v109_v24 = vld [vmem:[#allocation5 + $0x98] sm:$0xff]  ;;  %v625_v25 = vpack.c.bf16 %v104_v22, %v102_v21  ;;  %v106_v27 = vld [vmem:[#allocation5 + $0x80] sm:$0xff]  ;;  %v108_v28 = vld [vmem:[#allocation5 + $0x90] sm:$0xff] }
  0x51   :  { %v627_v26 = vpack.c.bf16 %v109_v24, %v107_v23  ;;  %v111_v29 = vld [vmem:[#allocation5 + $0xa8] sm:$0xff]  ;;  %v113_v30 = vld [vmem:[#allocation5 + $0xb8] sm:$0xff]  ;;  %v629_v31 = vpack.c.bf16 %v108_v28, %v106_v27  ;;  %v110_v33 = vld [vmem:[#allocation5 + $0xa0] sm:$0xff] }
  0x52   :  { %618 = vmatpush1.bf16.msra.mxu0 %v617_v13  ;;  %v631_v32 = vpack.c.bf16 %v113_v30, %v111_v29  ;;  %v112_v34 = vld [vmem:[#allocation5 + $0xb0] sm:$0xff]  ;;  %v115_v35 = vld [vmem:[#allocation5 + $0xc8] sm:$0xff]  ;;  %v117_v36 = vld [vmem:[#allocation5 + $0xd8] sm:$0xff] }
  0x53   :  { %620 = vmatprep.subr.bf16.mxu0 %v619_v14  ;;  %v633_v37 = vpack.c.bf16 %v112_v34, %v110_v33  ;;  %v635_v38 = vpack.c.bf16 %v117_v36, %v115_v35  ;;  %v114_v39 = vld [vmem:[#allocation5 + $0xc0] sm:$0xff]  ;;  %v116_v40 = vld [vmem:[#allocation5 + $0xd0] sm:$0xff]  ;;  %v87_v41 = vld [vmem:[#allocation2 + $0x8] sm:$0xff] }
  0x54   :  { %v119_v42 = vld [vmem:[#allocation5 + $0xe8] sm:$0xff]  ;;  %v121_v43 = vld [vmem:[#allocation5 + $0xf8] sm:$0xff]  ;;  %230 = vmatprep.mubr.f32.mxu0 %v87_v41  ;;  %v118_v45 = vld [vmem:[#allocation5 + $0xe0] sm:$0xff]  ;;  %v637_v50 = vpack.c.bf16 %v116_v40, %v114_v39 }
  0x55   :  { %v244_v44 = vld [vmem:[#allocation7 + $0x8] sm:$0xff]  ;;  %v120_v46 = vld [vmem:[#allocation5 + $0xf0] sm:$0xff]  ;;  %v246_v47 = vld [vmem:[#allocation7 + $0x18] sm:$0xff]  ;;  %v639_v56 = vpack.c.bf16 %v121_v43, %v119_v42 }
  0x56   :  { %622 = vmatpush1.bf16.msra.mxu0 %v621_v19  ;;  %v243_v48 = vld [vmem:[#allocation7] sm:$0xff]  ;;  %v245_v49 = vld [vmem:[#allocation7 + $0x10] sm:$0xff]  ;;  %v675_v51 = vpack.c.bf16 %v246_v47, %v244_v44  ;;  %v248_v53 = vld [vmem:[#allocation7 + $0x28] sm:$0xff]  ;;  %v641_v0 = vpack.c.bf16 %v120_v46, %v118_v45 }
  0x57   :  { %624 = vmatprep.subr.bf16.mxu0 %v623_v20  ;;  %v677_v52 = vpack.c.bf16 %v245_v49, %v243_v48  ;;  %v250_v54 = vld [vmem:[#allocation7 + $0x38] sm:$0xff]  ;;  %v247_v55 = vld [vmem:[#allocation7 + $0x20] sm:$0xff]  ;;  %v249_v58 = vld [vmem:[#allocation7 + $0x30] sm:$0xff] }
  0x58   :  { %v679_v57 = vpack.c.bf16 %v250_v54, %v248_v53  ;;  %v252_v59 = vld [vmem:[#allocation7 + $0x48] sm:$0xff]  ;;  %v254_v60 = vld [vmem:[#allocation7 + $0x58] sm:$0xff]  ;;  %676 = vmatprep.subr.bf16.mxu1 %v675_v51  ;;  %v681_v63 = vpack.c.bf16 %v249_v58, %v247_v55  ;;  %v122_v1 = vld [vmem:[#allocation5 + $0x100] sm:$0xff] }
  0x59   :  { %v123_v61 = vld [vmem:[#allocation5 + $0x108] sm:$0xff]  ;;  %v125_v62 = vld [vmem:[#allocation5 + $0x118] sm:$0xff]  ;;  %678 = vmatpush1.bf16.msra.mxu1 %v677_v52  ;;  %v683_v2 = vpack.c.bf16 %v254_v60, %v252_v59  ;;  %v251_v3 = vld [vmem:[#allocation7 + $0x40] sm:$0xff] }
  0x5a   :  { %626 = vmatpush1.bf16.msra.mxu0 %v625_v25  ;;  %680 = vmatprep.subr.bf16.mxu1 %v679_v57  ;;  %v253_v4 = vld [vmem:[#allocation7 + $0x50] sm:$0xff]  ;;  %v643_v5 = vpack.c.bf16 %v125_v62, %v123_v61  ;;  %v256_v7 = vld [vmem:[#allocation7 + $0x68] sm:$0xff]  ;;  %v258_v8 = vld [vmem:[#allocation7 + $0x78] sm:$0xff] }
  0x5b   :  { %628 = vmatprep.subr.bf16.mxu0 %v627_v26  ;;  %v124_v6 = vld [vmem:[#allocation5 + $0x110] sm:$0xff]  ;;  %v127_v9 = vld [vmem:[#allocation5 + $0x128] sm:$0xff]  ;;  %v129_v10 = vld [vmem:[#allocation5 + $0x138] sm:$0xff]  ;;  %v685_v11 = vpack.c.bf16 %v253_v4, %v251_v3  ;;  %v687_v14 = vpack.c.bf16 %v258_v8, %v256_v7 }
  0x5c   :  { %v645_v12 = vpack.c.bf16 %v124_v6, %v122_v1  ;;  %v126_v13 = vld [vmem:[#allocation5 + $0x120] sm:$0xff]  ;;  %v257_v16 = vld [vmem:[#allocation7 + $0x70] sm:$0xff]  ;;  %v647_v17 = vpack.c.bf16 %v129_v10, %v127_v9  ;;  %v260_v19 = vld [vmem:[#allocation7 + $0x88] sm:$0xff] }
  0x5d   :  { %682 = vmatpush1.bf16.msra.mxu1 %v681_v63  ;;  %v255_v15 = vld [vmem:[#allocation7 + $0x60] sm:$0xff]  ;;  %v128_v18 = vld [vmem:[#allocation5 + $0x130] sm:$0xff]  ;;  %v262_v20 = vld [vmem:[#allocation7 + $0x98] sm:$0xff] }
  0x5e   :  { %630 = vmatpush1.bf16.msra.mxu0 %v629_v31  ;;  %684 = vmatprep.subr.bf16.mxu1 %v683_v2  ;;  %v131_v21 = vld [vmem:[#allocation5 + $0x148] sm:$0xff]  ;;  %v133_v22 = vld [vmem:[#allocation5 + $0x158] sm:$0xff]  ;;  %v689_v23 = vpack.c.bf16 %v257_v16, %v255_v15  ;;  %v649_v24 = vpack.c.bf16 %v128_v18, %v126_v13  ;;  %v130_v25 = vld [vmem:[#allocation5 + $0x140] sm:$0xff]  ;;  %v691_v26 = vpack.c.bf16 %v262_v20, %v260_v19 }
  0x5f   :  { %632 = vmatprep.subr.bf16.mxu0 %v631_v32  ;;  %v259_v27 = vld [vmem:[#allocation7 + $0x80] sm:$0xff]  ;;  %v261_v28 = vld [vmem:[#allocation7 + $0x90] sm:$0xff]  ;;  %v651_v29 = vpack.c.bf16 %v133_v22, %v131_v21  ;;  %v264_v31 = vld [vmem:[#allocation7 + $0xa8] sm:$0xff] }
  0x60   :  { %v132_v30 = vld [vmem:[#allocation5 + $0x150] sm:$0xff]  ;;  %v266_v32 = vld [vmem:[#allocation7 + $0xb8] sm:$0xff]  ;;  %v135_v33 = vld [vmem:[#allocation5 + $0x168] sm:$0xff]  ;;  %v693_v35 = vpack.c.bf16 %v261_v28, %v259_v27 }
  0x61   :  { %686 = vmatpush1.bf16.msra.mxu1 %v685_v11  ;;  %v137_v34 = vld [vmem:[#allocation5 + $0x178] sm:$0xff]  ;;  %v653_v36 = vpack.c.bf16 %v132_v30, %v130_v25  ;;  %v263_v39 = vld [vmem:[#allocation7 + $0xa0] sm:$0xff]  ;;  %v265_v40 = vld [vmem:[#allocation7 + $0xb0] sm:$0xff] }
  0x62   :  { %634 = vmatpush1.bf16.msra.mxu0 %v633_v37  ;;  %688 = vmatprep.subr.bf16.mxu1 %v687_v14  ;;  %v134_v37 = vld [vmem:[#allocation5 + $0x160] sm:$0xff]  ;;  %v655_v41 = vpack.c.bf16 %v137_v34, %v135_v33  ;;  %v136_v42 = vld [vmem:[#allocation5 + $0x170] sm:$0xff]  ;;  %v268_v43 = vld [vmem:[#allocation7 + $0xc8] sm:$0xff]  ;;  %v697_v47 = vpack.c.bf16 %v265_v40, %v263_v39 }
  0x63   :  { %636 = vmatprep.subr.bf16.mxu0 %v635_v38  ;;  %v695_v38 = vpack.c.bf16 %v266_v32, %v264_v31  ;;  %v270_v44 = vld [vmem:[#allocation7 + $0xd8] sm:$0xff]  ;;  %v139_v45 = vld [vmem:[#allocation5 + $0x188] sm:$0xff]  ;;  %v657_v48 = vpack.c.bf16 %v136_v42, %v134_v37  ;;  %v138_v49 = vld [vmem:[#allocation5 + $0x180] sm:$0xff] }
  0x64   :  { %v141_v46 = vld [vmem:[#allocation5 + $0x198] sm:$0xff]  ;;  %v267_v51 = vld [vmem:[#allocation7 + $0xc0] sm:$0xff]  ;;  %v269_v52 = vld [vmem:[#allocation7 + $0xd0] sm:$0xff] }
  0x65   :  { %690 = vmatpush1.bf16.msra.mxu1 %v689_v23  ;;  %v659_v53 = vpack.c.bf16 %v141_v46, %v139_v45  ;;  %v140_v54 = vld [vmem:[#allocation5 + $0x190] sm:$0xff]  ;;  %v272_v55 = vld [vmem:[#allocation7 + $0xe8] sm:$0xff]  ;;  %v145_v58 = vld [vmem:[#allocation5 + $0x1b8] sm:$0xff]  ;;  %v701_v59 = vpack.c.bf16 %v269_v52, %v267_v51 }
  0x66   :  { %638 = vmatpush1.bf16.msra.mxu0 %v637_v50  ;;  %692 = vmatprep.subr.bf16.mxu1 %v691_v26  ;;  %v699_v50 = vpack.c.bf16 %v270_v44, %v268_v43  ;;  %v143_v57 = vld [vmem:[#allocation5 + $0x1a8] sm:$0xff]  ;;  %v661_v60 = vpack.c.bf16 %v140_v54, %v138_v49  ;;  %v142_v61 = vld [vmem:[#allocation5 + $0x1a0] sm:$0xff]  ;;  %v144_v2 = vld [vmem:[#allocation5 + $0x1b0] sm:$0xff] }
  0x67   :  { %640 = vmatprep.subr.bf16.mxu0 %v639_v56  ;;  %v274_v56 = vld [vmem:[#allocation7 + $0xf8] sm:$0xff]  ;;  %v271_v63 = vld [vmem:[#allocation7 + $0xe0] sm:$0xff]  ;;  %v663_v1 = vpack.c.bf16 %v145_v58, %v143_v57  ;;  %v276_v3 = vld [vmem:[#allocation7 + $0x108] sm:$0xff]  ;;  %v665_v8 = vpack.c.bf16 %v144_v2, %v142_v61 }
  0x68   :  { %v703_v62 = vpack.c.bf16 %v274_v56, %v272_v55  ;;  %v278_v4 = vld [vmem:[#allocation7 + $0x118] sm:$0xff]  ;;  %v146_v9 = vld [vmem:[#allocation5 + $0x1c0] sm:$0xff]  ;;  %v148_v14 = vld [vmem:[#allocation5 + $0x1d0] sm:$0xff] }
  0x69   :  { %694 = vmatpush1.bf16.msra.mxu1 %v693_v35  ;;  %v149_v6 = vld [vmem:[#allocation5 + $0x1d8] sm:$0xff]  ;;  %v707_v10 = vpack.c.bf16 %v278_v4, %v276_v3  ;;  %v275_v11 = vld [vmem:[#allocation7 + $0x100] sm:$0xff]  ;;  %v280_v15 = vld [vmem:[#allocation7 + $0x128] sm:$0xff]  ;;  %v669_v20 = vpack.c.bf16 %v148_v14, %v146_v9 }
  0x6a   :  { %642 = vmatpush1.bf16.msra.mxu0 %v641_v0  ;;  %696 = vmatprep.subr.bf16.mxu1 %v695_v38  ;;  %v273_v0 = vld [vmem:[#allocation7 + $0xf0] sm:$0xff]  ;;  %v282_v16 = vld [vmem:[#allocation7 + $0x138] sm:$0xff]  ;;  %v150_v21 = vld [vmem:[#allocation5 + $0x1e0] sm:$0xff] }
  0x6b   :  { %644 = vmatprep.subr.bf16.mxu0 %v643_v5  ;;  %v147_v5 = vld [vmem:[#allocation5 + $0x1c8] sm:$0xff]  ;;  %v705_v7 = vpack.c.bf16 %v273_v0, %v271_v63  ;;  %v153_v18 = vld [vmem:[#allocation5 + $0x1f8] sm:$0xff]  ;;  %v711_v22 = vpack.c.bf16 %v282_v16, %v280_v15  ;;  %v279_v23 = vld [vmem:[#allocation7 + $0x120] sm:$0xff] }
  0x6c   :  { %v667_v13 = vpack.c.bf16 %v149_v6, %v147_v5  ;;  %v152_v26 = vld [vmem:[#allocation5 + $0x1f0] sm:$0xff]  ;;  %v284_v27 = vld [vmem:[#allocation7 + $0x148] sm:$0xff]  ;;  %v286_v28 = vld [vmem:[#allocation7 + $0x158] sm:$0xff] }
  0x6d   :  { %698 = vmatpush1.bf16.msra.mxu1 %v697_v47  ;;  %v673_v30 = vpack.c.bf16 %v152_v26, %v150_v21  ;;  %v715_v31 = vpack.c.bf16 %v286_v28, %v284_v27  ;;  %v283_v32 = vld [vmem:[#allocation7 + $0x140] sm:$0xff]  ;;  %v285_v33 = vld [vmem:[#allocation7 + $0x150] sm:$0xff]  ;;  %v288_v34 = vld [vmem:[#allocation7 + $0x168] sm:$0xff] }
  0x6e   :  { %646 = vmatpush1.bf16.msra.mxu0 %v645_v12  ;;  %700 = vmatprep.subr.bf16.mxu1 %v699_v50  ;;  %v277_v12 = vld [vmem:[#allocation7 + $0x110] sm:$0xff]  ;;  %v290_v35 = vld [vmem:[#allocation7 + $0x178] sm:$0xff]  ;;  %v86_v37 = vld [vmem:[#allocation2] sm:$0xff] }
  0x6f   :  { %648 = vmatprep.subr.bf16.mxu0 %v647_v17  ;;  %v151_v17 = vld [vmem:[#allocation5 + $0x1e8] sm:$0xff]  ;;  %v709_v19 = vpack.c.bf16 %v277_v12, %v275_v11  ;;  %v719_v38 = vpack.c.bf16 %v290_v35, %v288_v34  ;;  %v287_v39 = vld [vmem:[#allocation7 + $0x160] sm:$0xff]  ;;  %v289_v40 = vld [vmem:[#allocation7 + $0x170] sm:$0xff] }
  0x70   :  { %v671_v25 = vpack.c.bf16 %v153_v18, %v151_v17  ;;  %v292_v42 = vld [vmem:[#allocation7 + $0x188] sm:$0xff]  ;;  %v294_v43 = vld [vmem:[#allocation7 + $0x198] sm:$0xff]  ;;  %v721_v44 = vpack.c.bf16 %v289_v40, %v287_v39  ;;  %v88_v45 = vld [vmem:[#allocation2 + $0x10] sm:$0xff] }
  0x71   :  { %702 = vmatpush1.bf16.msra.mxu1 %v701_v59  ;;  %v723_v46 = vpack.c.bf16 %v294_v43, %v292_v42  ;;  %v291_v47 = vld [vmem:[#allocation7 + $0x180] sm:$0xff]  ;;  %v296_v49 = vld [vmem:[#allocation7 + $0x1a8] sm:$0xff]  ;;  %v298_v50 = vld [vmem:[#allocation7 + $0x1b8] sm:$0xff] }
  0x72   :  { %650 = vmatpush1.bf16.msra.mxu0 %v649_v24  ;;  %704 = vmatprep.subr.bf16.mxu1 %v703_v62  ;;  %v281_v24 = vld [vmem:[#allocation7 + $0x130] sm:$0xff]  ;;  %v727_v52 = vpack.c.bf16 %v298_v50, %v296_v49  ;;  %v300_v55 = vld [vmem:[#allocation7 + $0x1c8] sm:$0xff]  ;;  %v302_v56 = vld [vmem:[#allocation7 + $0x1d8] sm:$0xff] }
  0x73   :  { %652 = vmatprep.subr.bf16.mxu0 %v651_v29  ;;  %v713_v29 = vpack.c.bf16 %v281_v24, %v279_v23  ;;  %v297_v54 = vld [vmem:[#allocation7 + $0x1b0] sm:$0xff]  ;;  %v731_v58 = vpack.c.bf16 %v302_v56, %v300_v55  ;;  %v299_v59 = vld [vmem:[#allocation7 + $0x1c0] sm:$0xff]  ;;  %v304_v62 = vld [vmem:[#allocation7 + $0x1e8] sm:$0xff] }
  0x74   :  { %v306_v63 = vld [vmem:[#allocation7 + $0x1f8] sm:$0xff]  ;;  %v305_v2 = vld [vmem:[#allocation7 + $0x1f0] sm:$0xff]  ;;  %v401_v4 = vld [vmem:[#allocation8 + $0x8] sm:$0xff] }
  0x75   :  { %706 = vmatpush1.bf16.msra.mxu1 %v705_v7  ;;  %v735_v0 = vpack.c.bf16 %v306_v63, %v304_v62  ;;  %v403_v5 = vld [vmem:[#allocation8 + $0x18] sm:$0xff]  ;;  %v400_v6 = vld [vmem:[#allocation8] sm:$0xff]  ;;  %v405_v9 = vld [vmem:[#allocation8 + $0x28] sm:$0xff] }
  0x76   :  { %654 = vmatpush1.bf16.msra.mxu0 %v653_v36  ;;  %708 = vmatprep.subr.bf16.mxu1 %v707_v10  ;;  %v717_v36 = vpack.c.bf16 %v285_v33, %v283_v32  ;;  %v739_v7 = vpack.c.bf16 %v403_v5, %v401_v4  ;;  %v407_v10 = vld [vmem:[#allocation8 + $0x38] sm:$0xff]  ;;  %v406_v14 = vld [vmem:[#allocation8 + $0x30] sm:$0xff]  ;;  %v409_v15 = vld [vmem:[#allocation8 + $0x48] sm:$0xff] }
  0x77   :  { %656 = vmatprep.subr.bf16.mxu0 %v655_v41  ;;  %v89_v41 = vld [vmem:[#allocation2 + $0x18] sm:$0xff]  ;;  %v1147_v12 = vpack.c.bf16 %v407_v10, %v405_v9  ;;  %v413_v21 = vld [vmem:[#allocation8 + $0x68] sm:$0xff]  ;;  %v414_v26 = vld [vmem:[#allocation8 + $0x70] sm:$0xff] }
  0x78   :  { %v411_v16 = vld [vmem:[#allocation8 + $0x58] sm:$0xff]  ;;  %v417_v27 = vld [vmem:[#allocation8 + $0x88] sm:$0xff]  ;;  %v418_v32 = vld [vmem:[#allocation8 + $0x90] sm:$0xff] }
  0x79   :  { %710 = vmatpush1.bf16.msra.mxu1 %v709_v19  ;;  %v1153_v18 = vpack.c.bf16 %v411_v16, %v409_v15  ;;  %v408_v19 = vld [vmem:[#allocation8 + $0x40] sm:$0xff]  ;;  %v419_v28 = vld [vmem:[#allocation8 + $0x98] sm:$0xff]  ;;  %v421_v33 = vld [vmem:[#allocation8 + $0xa8] sm:$0xff] }
  0x7a   :  { %658 = vmatpush1.bf16.msra.mxu0 %v657_v48  ;;  %712 = vmatprep.subr.bf16.mxu1 %v711_v22  ;;  %v293_v48 = vld [vmem:[#allocation7 + $0x190] sm:$0xff]  ;;  %v415_v22 = vld [vmem:[#allocation8 + $0x78] sm:$0xff]  ;;  %v425_v39 = vld [vmem:[#allocation8 + $0xc8] sm:$0xff] }
  0x7b   :  { %660 = vmatprep.subr.bf16.mxu0 %v659_v53  ;;  %v725_v51 = vpack.c.bf16 %v293_v48, %v291_v47  ;;  %v295_v53 = vld [vmem:[#allocation7 + $0x1a0] sm:$0xff]  ;;  %v1159_v24 = vpack.c.bf16 %v415_v22, %v413_v21  ;;  %v423_v34 = vld [vmem:[#allocation8 + $0xb8] sm:$0xff]  ;;  %v430_v50 = vld [vmem:[#allocation8 + $0xf0] sm:$0xff] }
  0x7c   :  { %v729_v57 = vpack.c.bf16 %v297_v54, %v295_v53  ;;  %v427_v40 = vld [vmem:[#allocation8 + $0xd8] sm:$0xff]  ;;  %v424_v43 = vld [vmem:[#allocation8 + $0xc0] sm:$0xff]  ;;  %v434_v56 = vld [vmem:[#allocation8 + $0x110] sm:$0xff] }
  0x7d   :  { %714 = vmatpush1.bf16.msra.mxu1 %v713_v29  ;;  %v1177_v42 = vpack.c.bf16 %v427_v40, %v425_v39  ;;  %v428_v49 = vld [vmem:[#allocation8 + $0xe0] sm:$0xff]  ;;  %v438_v62 = vld [vmem:[#allocation8 + $0x130] sm:$0xff]  ;;  %v441_v63 = vld [vmem:[#allocation8 + $0x148] sm:$0xff] }
  0x7e   :  { %662 = vmatpush1.bf16.msra.mxu0 %v661_v60  ;;  %716 = vmatprep.subr.bf16.mxu1 %v715_v31  ;;  %v301_v60 = vld [vmem:[#allocation7 + $0x1d0] sm:$0xff]  ;;  %v416_v31 = vld [vmem:[#allocation8 + $0x80] sm:$0xff]  ;;  %v1186_v53 = vpack.c.bf16 %v430_v50, %v428_v49  ;;  %v445_v5 = vld [vmem:[#allocation8 + $0x168] sm:$0xff] }
  0x7f   :  { %664 = vmatprep.subr.bf16.mxu0 %v663_v1  ;;  %v733_v61 = vpack.c.bf16 %v301_v60, %v299_v59  ;;  %v303_v1 = vld [vmem:[#allocation7 + $0x1e0] sm:$0xff]  ;;  %v1168_v35 = vpack.c.bf16 %v418_v32, %v416_v31  ;;  %v442_v4 = vld [vmem:[#allocation8 + $0x150] sm:$0xff]  ;;  %v453_v21 = vld [vmem:[#allocation8 + $0x1a8] sm:$0xff] }
  0x80   :  { %v737_v3 = vpack.c.bf16 %v305_v2, %v303_v1  ;;  %v432_v55 = vld [vmem:[#allocation8 + $0x100] sm:$0xff]  ;;  %v446_v10 = vld [vmem:[#allocation8 + $0x170] sm:$0xff]  ;;  %v455_v22 = vld [vmem:[#allocation8 + $0x1b8] sm:$0xff] }
  0x81   :  { %718 = vmatpush1.bf16.msra.mxu1 %v717_v36  ;;  %v1171_v36 = vpack.c.bf16 %v423_v34, %v421_v33  ;;  %v1192_v59 = vpack.c.bf16 %v434_v56, %v432_v55  ;;  %v444_v9 = vld [vmem:[#allocation8 + $0x160] sm:$0xff]  ;;  %v457_v31 = vld [vmem:[#allocation8 + $0x1c8] sm:$0xff]  ;;  %v459_v32 = vld [vmem:[#allocation8 + $0x1d8] sm:$0xff] }
  0x82   :  { %666 = vmatpush1.bf16.msra.mxu0 %v665_v8  ;;  %720 = vmatprep.subr.bf16.mxu1 %v719_v38  ;;  %v402_v8 = vld [vmem:[#allocation8 + $0x10] sm:$0xff]  ;;  %v1210_v15 = vpack.c.bf16 %v446_v10, %v444_v9  ;;  %v795_v34 = vpack.c.bf16 %v459_v32, %v457_v31  ;;  %v154_v40 = vld [vmem:[%s1301_s2] sm:$0x3] }
  0x83   :  { %668 = vmatprep.subr.bf16.mxu0 %v667_v13  ;;  %v1145_v11 = vpack.c.bf16 %v402_v8, %v400_v6  ;;  %v404_v13 = vld [vmem:[#allocation8 + $0x20] sm:$0xff]  ;;  %v422_v38 = vld [vmem:[#allocation8 + $0xb0] sm:$0xff]  ;;  %v447_v6 = vld [vmem:[#allocation8 + $0x178] sm:$0xff] }
  0x84   :  { %v1150_v17 = vpack.c.bf16 %v406_v14, %v404_v13  ;;  %v1207_v8 = vpack.c.bf16 %v447_v6, %v445_v5  ;;  %v449_v13 = vld [vmem:[#allocation8 + $0x188] sm:$0xff]  ;;  %v451_v14 = vld [vmem:[#allocation8 + $0x198] sm:$0xff] }
  0x85   :  { %722 = vmatpush1.bf16.msra.mxu1 %v721_v44  ;;  %v426_v44 = vld [vmem:[#allocation8 + $0xd0] sm:$0xff]  ;;  %v1213_v16 = vpack.c.bf16 %v451_v14, %v449_v13 }
  0x86   :  { %670 = vmatpush1.bf16.msra.mxu0 %v669_v20  ;;  %724 = vmatprep.subr.bf16.mxu1 %v723_v46  ;;  %v410_v20 = vld [vmem:[#allocation8 + $0x50] sm:$0xff]  ;;  %v431_v46 = vld [vmem:[#allocation8 + $0xf8] sm:$0xff]  ;;  %v1180_v47 = vpack.c.bf16 %v426_v44, %v424_v43 }
  0x87   :  { %672 = vmatprep.subr.bf16.mxu0 %v671_v25  ;;  %v1156_v23 = vpack.c.bf16 %v410_v20, %v408_v19  ;;  %v412_v25 = vld [vmem:[#allocation8 + $0x60] sm:$0xff]  ;;  %v450_v20 = vld [vmem:[#allocation8 + $0x190] sm:$0xff] }
  0x88   :  { %v1162_v29 = vpack.c.bf16 %v414_v26, %v412_v25  ;;  %v448_v19 = vld [vmem:[#allocation8 + $0x180] sm:$0xff]  ;;  %v791_v26 = vpack.c.bf16 %v455_v22, %v453_v21 }
  0x89   :  { %726 = vmatpush1.bf16.msra.mxu1 %v725_v51  ;;  %v433_v51 = vld [vmem:[#allocation8 + $0x108] sm:$0xff]  ;;  %v789_v25 = vpack.c.bf16 %v450_v20, %v448_v19 }
  0x8a   :  { %674 = vmatpush1.bf16.msra.mxu0 %v673_v30  ;;  %728 = vmatprep.subr.bf16.mxu1 %v727_v52  ;;  %v1165_v30 = vpack.c.bf16 %v419_v28, %v417_v27  ;;  %v435_v52 = vld [vmem:[#allocation8 + $0x118] sm:$0xff]  ;;  %v452_v27 = vld [vmem:[#allocation8 + $0x1a0] sm:$0xff]  ;;  %v454_v28 = vld [vmem:[#allocation8 + $0x1b0] sm:$0xff] }
  0x8b   :  { %740 = vmatprep.subr.bf16.mxu0 %v739_v7  ;;  %v1189_v54 = vpack.c.bf16 %v435_v52, %v433_v51  ;;  %v793_v33 = vpack.c.bf16 %v454_v28, %v452_v27 }
  0x8d   :  { %231 = vmatmul.mubr.f32.vlgmr.msra.gmra.mrb[0].mxu0 %v86_v37  ;;  %730 = vmatpush1.bf16.msra.mxu1 %v729_v57  ;;  %v420_v37 = vld [vmem:[#allocation8 + $0xa0] sm:$0xff]  ;;  %v437_v57 = vld [vmem:[#allocation8 + $0x128] sm:$0xff] }
  0x8e   :  { %236 = vmatprep.mubr.f32.mxu0 %v89_v41  ;;  %732 = vmatprep.subr.bf16.mxu1 %v731_v58  ;;  %v1174_v41 = vpack.c.bf16 %v422_v38, %v420_v37  ;;  %v439_v58 = vld [vmem:[#allocation8 + $0x138] sm:$0xff]  ;;  %v156_v37 = vlaneseq }
  0x8f   :  { %742 = vmatpush1.bf16.msra.mxu0 %v1145_v11  ;;  %v1195_v60 = vpack.c.bf16 %v439_v58, %v437_v57 }
  0x90   :  { %744 = vmatprep.subr.bf16.mxu0 %v1147_v12  ;;  %v157_v38 = vshrl.u32 %v156_v37, 7 }
  0x91   :  { %237 = vmatmul.mubr.f32.gmra.mrb[2].mxu0 %v88_v45  ;;  %734 = vmatpush1.bf16.msra.mxu1 %v733_v61  ;;  %v429_v45 = vld [vmem:[#allocation8 + $0xe8] sm:$0xff]  ;;  %v436_v61 = vld [vmem:[#allocation8 + $0x120] sm:$0xff] }
  0x92   :  { %736 = vmatprep.subr.bf16.mxu1 %v735_v0  ;;  %v1183_v48 = vpack.c.bf16 %v431_v46, %v429_v45  ;;  %v443_v0 = vld [vmem:[#allocation8 + $0x158] sm:$0xff]  ;;  %v1198_v1 = vpack.c.bf16 %v438_v62, %v436_v61  ;;  %v1217_v39 = vsub.s32 0, %v157_v38  ;;  %v1222_v43 = vsub.s32 1, %v157_v38 }
  0x93   :  { %746 = vmatpush1.bf16.msra.mxu0 %v1150_v17  ;;  %v1201_v2 = vpack.c.bf16 %v443_v0, %v441_v63 }
  0x94   :  { %748 = vmatprep.subr.bf16.mxu0 %v1153_v18  ;;  %v159_v44 = vrot.slane %v154_v40, %v1217_v39  ;;  %v163_v45 = vrot.slane %v154_v40, %v1222_v43 }
  0x95   :  { %738 = vmatpush1.bf16.msra.mxu1 %v737_v3  ;;  %v440_v3 = vld [vmem:[#allocation8 + $0x140] sm:$0xff] }
  0x96   :  { %803 = vmatprep.subr.bf16.mxu1 %v739_v7  ;;  %v1204_v7 = vpack.c.bf16 %v442_v4, %v440_v3 }
  0x97   :  { %750 = vmatpush1.bf16.msra.mxu0 %v1156_v23 }
  0x98   :  { %752 = vmatprep.subr.bf16.mxu0 %v1159_v24 }
  0x9b   :  { %754 = vmatpush1.bf16.msra.mxu0 %v1162_v29 }
  0x9c   :  { %756 = vmatprep.subr.bf16.mxu0 %v1165_v30 }
  0x9f   :  { %758 = vmatpush1.bf16.msra.mxu0 %v1168_v35 }
  0xa0   :  { %760 = vmatprep.subr.bf16.mxu0 %v1171_v36 }
  0xa3   :  { %762 = vmatpush1.bf16.msra.mxu0 %v1174_v41 }
  0xa4   :  { %764 = vmatprep.subr.bf16.mxu0 %v1177_v42 }
  0xa7   :  { %766 = vmatpush1.bf16.msra.mxu0 %v1180_v47 }
  0xa8   :  { %768 = vmatprep.subr.bf16.mxu0 %v1183_v48 }
  0xab   :  { %770 = vmatpush1.bf16.msra.mxu0 %v1186_v53 }
  0xac   :  { %772 = vmatprep.subr.bf16.mxu0 %v1189_v54 }
  0xaf   :  { %774 = vmatpush1.bf16.msra.mxu0 %v1192_v59 }
  0xb0   :  { %776 = vmatprep.subr.bf16.mxu0 %v1195_v60 }
  0xb3   :  { %778 = vmatpush1.bf16.msra.mxu0 %v1198_v1 }
  0xb4   :  { %780 = vmatprep.subr.bf16.mxu0 %v1201_v2 }
  0xb7   :  { %782 = vmatpush1.bf16.msra.mxu0 %v1204_v7 }
  0xb8   :  { %784 = vmatprep.subr.bf16.mxu0 %v1207_v8 }
  0xbb   :  { %786 = vmatpush1.bf16.msra.mxu0 %v1210_v15 }
  0xbc   :  { %788 = vmatprep.subr.bf16.mxu0 %v1213_v16 }
  0xbf   :  { %790 = vmatpush1.bf16.msra.mxu0 %v789_v25 }
  0xc0   :  { %792 = vmatprep.subr.bf16.mxu0 %v791_v26 }
  0xc3   :  { %794 = vmatpush1.bf16.msra.mxu0 %v793_v33 }
  0xc4   :  { %796 = vmatprep.subr.bf16.mxu0 %v795_v34 }
 0x160   :  { %v232_v46 = vpop.f32.mrb[0].mxu0 }
 0x161   :  { %v233_v49 = vadd.f32 %v232_v46, %v159_v44  ;;  %v234_v50 = vpop.f32.mrb[1].mxu0 }
 0x162   :  { %v235_v51 = vadd.f32 %v234_v50, %v163_v45 }
 0x163   :  { %553 = vst [vmem:[#allocation10] sm:$0xff] %v233_v49 }
 0x164   :  { %555 = vst [vmem:[#allocation11] sm:$0xff] %v235_v51  ;;  %v238_v52 = vpop.f32.mrb[2].mxu0  ;;  %383 = vmatprep.mubr.f32.mxu1 %v235_v51 }
 0x165   :  { %v239_v55 = vadd.f32 %v238_v52, %v159_v44  ;;  %v240_v56 = vpop.f32.mrb[3].mxu0  ;;  %384 = vmatmul.mubr.f32.vlgmr.msra.gmra.mrb[0].mxu1 %v233_v49 }
 0x166   :  { %v241_v57 = vadd.f32 %v240_v56, %v163_v45  ;;  %819 = vmatpush1.bf16.msra.mxu1 %v1145_v11  ;;  %v456_v11 = vld [vmem:[#allocation8 + $0x1c0] sm:$0xff] }
 0x167   :  { %554 = vst [vmem:[#allocation10 + $0x8] sm:$0xff] %v239_v55  ;;  %804 = vmatprep.subr.bf16.mxu1 %v1147_v12  ;;  %v458_v12 = vld [vmem:[#allocation8 + $0x1d0] sm:$0xff] }
 0x168   :  { %556 = vst [vmem:[#allocation11 + $0x8] sm:$0xff] %v241_v57  ;;  %389 = vmatprep.mubr.f32.mxu1 %v241_v57 }
 0x169   :  { %390 = vmatmul.mubr.f32.gmra.mrb[2].mxu1 %v239_v55 }
 0x16a   :  { %820 = vmatpush1.bf16.msra.mxu1 %v1150_v17  ;;  %v797_v17 = vpack.c.bf16 %v458_v12, %v456_v11 }
 0x16b   :  { %805 = vmatprep.subr.bf16.mxu1 %v1153_v18  ;;  %v461_v18 = vld [vmem:[#allocation8 + $0x1e8] sm:$0xff] }
 0x16c   :  { %798 = vmatpush1.bf16.msra.mxu0 %v797_v17 }
 0x16e   :  { %821 = vmatpush1.bf16.msra.mxu1 %v1156_v23  ;;  %v463_v23 = vld [vmem:[#allocation8 + $0x1f8] sm:$0xff] }
 0x16f   :  { %806 = vmatprep.subr.bf16.mxu1 %v1159_v24  ;;  %v799_v24 = vpack.c.bf16 %v463_v23, %v461_v18 }
 0x171   :  { %800 = vmatprep.subr.bf16.mxu0 %v799_v24 }
 0x172   :  { %822 = vmatpush1.bf16.msra.mxu1 %v1162_v29  ;;  %v460_v29 = vld [vmem:[#allocation8 + $0x1e0] sm:$0xff] }
 0x173   :  { %807 = vmatprep.subr.bf16.mxu1 %v1165_v30  ;;  %v462_v30 = vld [vmem:[#allocation8 + $0x1f0] sm:$0xff] }
 0x176   :  { %823 = vmatpush1.bf16.msra.mxu1 %v1168_v35  ;;  %v801_v35 = vpack.c.bf16 %v462_v30, %v460_v29 }
 0x177   :  { %808 = vmatprep.subr.bf16.mxu1 %v1171_v36  ;;  %v307_v36 = vld [vmem:[%s1303_s4] sm:$0x3]  ;;  %s1016_s4 = smov [#allocation11]  }
 0x178   :  { %802 = vmatpush1.bf16.msra.mxu0 %v801_v35  ;;  %s578_s18 = sshll.u32 %s1016_s4, 4  ;;  %s579_s18 = int_to_ptr.vmem [resolvable:$true] %s578_s18 }
 0x179   :  { %s934_s23 = scalar_lea.vmem %s579_s18, 256  ;;  %p939_p5 = scmp.lt.s32.totalorder %s579_s18, %s579_s18 }
 0x17a   :  { %824 = vmatpush1.bf16.msra.mxu1 %v1174_v41  ;;  %v312_v41 = vrot.slane %v307_v36, %v1217_v39  ;;  %p935_p4 = scmp.ne.s32.totalorder %s579_s18, %s934_s23  ;;  %p940_p6 = scmp.lt.s32.totalorder %s934_s23, %s934_s23 }
 0x17b   :  { %809 = vmatprep.subr.bf16.mxu1 %v1177_v42  ;;  %v316_v42 = vrot.slane %v307_v36, %v1222_v43 }
 0x17c   :  { %p941_p7 = por %p940_p6, %p939_p5 }
 0x17e   :  { %825 = vmatpush1.bf16.msra.mxu1 %v1180_v47  ;;  %p942_p8 = pnand %p941_p7, %p935_p4 }
 0x17f   :  { %810 = vmatprep.subr.bf16.mxu1 %v1183_v48 }
 0x182   :  { %826 = vmatpush1.bf16.msra.mxu1 %v1186_v53 }
 0x183   :  { %811 = vmatprep.subr.bf16.mxu1 %v1189_v54 }
 0x186   :  { %827 = vmatpush1.bf16.msra.mxu1 %v1192_v59 }
 0x187   :  { %812 = vmatprep.subr.bf16.mxu1 %v1195_v60 }
 0x18a   :  { %828 = vmatpush1.bf16.msra.mxu1 %v1198_v1 }
 0x18b   :  { %813 = vmatprep.subr.bf16.mxu1 %v1201_v2 }
 0x18e   :  { %829 = vmatpush1.bf16.msra.mxu1 %v1204_v7 }
 0x18f   :  { %814 = vmatprep.subr.bf16.mxu1 %v1207_v8 }
 0x192   :  { %830 = vmatpush1.bf16.msra.mxu1 %v1210_v15 }
 0x193   :  { %815 = vmatprep.subr.bf16.mxu1 %v1213_v16 }
 0x196   :  { %831 = vmatpush1.bf16.msra.mxu1 %v789_v25 }
 0x197   :  { %816 = vmatprep.subr.bf16.mxu1 %v791_v26 }
 0x19a   :  { %832 = vmatpush1.bf16.msra.mxu1 %v793_v33 }
 0x19b   :  { %817 = vmatprep.subr.bf16.mxu1 %v795_v34 }
 0x19e   :  { %833 = vmatpush1.bf16.msra.mxu1 %v797_v17 }
 0x19f   :  { %818 = vmatprep.subr.bf16.mxu1 %v799_v24 }
 0x1a2   :  { %834 = vmatpush1.bf16.msra.mxu1 %v801_v35 }
 0x238   :  { %v385_v47 = vpop.f32.mrb[0].mxu1 }
 0x239   :  { %v386_v48 = vadd.f32 %v385_v47, %v312_v41  ;;  %v387_v53 = vpop.f32.mrb[1].mxu1 }
 0x23a   :  { %v388_v54 = vadd.f32 %v387_v53, %v316_v42 }
 0x23b   :  { %v396_v60 = vmax.f32 %v386_v48, 0.0 }
 0x23c   :  { %v397_v58 = vmax.f32 %v388_v54, 0.0  ;;  %v391_v59 = vpop.f32.mrb[2].mxu1 }
 0x23d   :  { %v392_v61 = vadd.f32 %v391_v59, %v312_v41  ;;  %v393_v62 = vpop.f32.mrb[3].mxu1 }
 0x23e   :  { %v394_v63 = vadd.f32 %v393_v62, %v316_v42  ;;  %540 = vmatprep.mubr.f32.mxu0 %v397_v58 }
 0x23f   :  { %541 = vmatmul.mubr.f32.vlgmr.msra.gmra.mrb[4].mxu0 %v396_v60  ;;  %v398_v1 = vmax.f32 %v392_v61, 0.0 }
 0x240   :  { %v399_v0 = vmax.f32 %v394_v63, 0.0 }
 0x242   :  { %546 = vmatprep.mubr.f32.mxu1 %v399_v0 }
 0x243   :  { %547 = vmatmul.mubr.f32.vlgmr.msra.gmra.mrb[4].mxu1 %v398_v1 }
 0x244   :  { %945 = shalt.err (!%p942_p8)
}
 0x245   :  { %s946_s26 = scalar_lea.hbm %s1307_s8, 256 }
 0x246   :  { %p947_p9 = scmp.ne.s32.totalorder %s1307_s8, %s946_s26  ;;  %p950_p10 = scmp.lt.u32.totalorder %s946_s26, %s1307_s8 }
 0x248   :  { %p952_p11 = pnand %p950_p10, %p947_p9 }
 0x24a   :  { %955 = shalt.err (!%p952_p11)
}
 0x24b   :  { %s1018_s29 = smov 128   ;;  %s1019_s30 = smov 8  }
 0x24c   :  { %584 = dma.vmem_to_hbm [thread:$0]  %s579_s18, 256, %s1307_s8, [#allocation12], %s1018_s29, %s1018_s29, %s1019_s30  }
 0x24d   :  { %s956_s1 = scalar_lea.vmem %s567_s20, 256  ;;  %p961_p13 = scmp.lt.s32.totalorder %s567_s20, %s567_s20 }
 0x24e   :  { %p957_p12 = scmp.ne.s32.totalorder %s567_s20, %s956_s1  ;;  %p962_p0 = scmp.lt.s32.totalorder %s956_s1, %s956_s1 }
 0x250   :  { %p963_p1 = por %p962_p0, %p961_p13 }
 0x252   :  { %p964_p2 = pnand %p963_p1, %p957_p12 }
 0x254   :  { %967 = shalt.err (!%p964_p2)
}
 0x255   :  { %s968_s3 = scalar_lea.hbm %s1306_s7, 256 }
 0x256   :  { %p969_p3 = scmp.ne.s32.totalorder %s1306_s7, %s968_s3  ;;  %p972_p4 = scmp.lt.u32.totalorder %s968_s3, %s1306_s7 }
 0x258   :  { %p974_p5 = pnand %p972_p4, %p969_p3 }
 0x25a   :  { %977 = shalt.err (!%p974_p5)
}
 0x25b   :  { %572 = dma.vmem_to_hbm [thread:$0]  %s567_s20, 256, %s1306_s7, [#allocation4], %s1018_s29, %s1018_s29, %s1019_s30  }
 0x25c   :  { %v464_v2 = vld [vmem:[%s1305_s6] sm:$0x3]  ;;  %s1020_s19 = smov [#allocation13]  }
 0x25d   :  { %v469_v3 = vrot.slane %v464_v2, %v1217_v39  ;;  %v473_v4 = vrot.slane %v464_v2, %v1222_v43  ;;  %s590_s23 = sshll.u32 %s1020_s19, 4  ;;  %s591_s23 = int_to_ptr.vmem [resolvable:$true] %s590_s23 }
 0x25e   :  { %s978_s6 = scalar_lea.vmem %s591_s23, 512  ;;  %p983_p7 = scmp.lt.s32.totalorder %s591_s23, %s591_s23 }
 0x25f   :  { %p979_p6 = scmp.ne.s32.totalorder %s591_s23, %s978_s6  ;;  %p984_p8 = scmp.lt.s32.totalorder %s978_s6, %s978_s6 }
 0x261   :  { %p985_p9 = por %p984_p8, %p983_p7 }
 0x263   :  { %p986_p10 = pnand %p985_p9, %p979_p6 }
 0x312   :  { %v542_v5 = vpop.f32.mrb[4].mxu0 }
 0x313   :  { %v543_v6 = vadd.f32 %v542_v5, %v469_v3  ;;  %v544_v7 = vpop.f32.mrb[5].mxu0 }
 0x314   :  { %v545_v8 = vadd.f32 %v544_v7, %v473_v4 }
 0x315   :  { %557 = vst [vmem:[#allocation13] sm:$0xff] %v543_v6 }
 0x316   :  { %558 = vst [vmem:[#allocation13 + $0x8] sm:$0xff] %v545_v8  ;;  %v548_v9 = vpop.f32.mrb[4].mxu1 }
 0x317   :  { %v549_v10 = vadd.f32 %v548_v9, %v469_v3  ;;  %v550_v13 = vpop.f32.mrb[5].mxu1 }
 0x318   :  { %v551_v14 = vadd.f32 %v550_v13, %v473_v4 }
 0x319   :  { %559 = vst [vmem:[#allocation13 + $0x10] sm:$0xff] %v549_v10 }
 0x31a   :  { %560 = vst [vmem:[#allocation13 + $0x18] sm:$0xff] %v551_v14 }
 0x31b   :  { %989 = shalt.err (!%p986_p10)
}
 0x31c   :  { %s990_s24 = scalar_lea.hbm %s1308_s9, 512 }
 0x31d   :  { %p991_p11 = scmp.ne.s32.totalorder %s1308_s9, %s990_s24  ;;  %p994_p12 = scmp.lt.u32.totalorder %s990_s24, %s1308_s9 }
 0x31f   :  { %p996_p13 = pnand %p994_p12, %p991_p11 }
 0x321   :  { %999 = shalt.err (!%p996_p13)
}
 0x322   :  { %596 = dma.vmem_to_hbm [thread:$0]  %s591_s23, 512, %s1308_s9, [#allocation12], %s1012_s21, %s1012_s21, %s1013_s22  }
 0x323   :  { %1006 = dma.done.wait [#allocation4], 256  }
 0x324   :  { %1007 = vsyncadd [#allocation4], 4294967040 }
 0x325   :  { %1008 = dma.done.wait [#allocation12], 768  }
 0x326   :  { %1009 = vsyncadd [#allocation12], 4294966528 }
 0x327   :  { %606 = vsyncpa [#allocation3], 1 }
 0x328   :  { %607 = vsyncpa [#allocation6], 1 }
 0x329   :  { %608 = vsyncpa [#allocation9], 1 }
 0x32a   :  { %609 = vsyncpa [#allocation4], 1 }
 0x32b   :  { %610 = vsyncpa [#allocation12], 1 }

// kernel: tpu_custom_call.1
= control target key start
LH: loop header
LB: loop body
LE: loop exit
PB: predicated region body
PF: predicated region fallthrough
CT: control target
= control target key end

     0   :  { %15 = vsyncpa [#allocation3], 0  ;;  %s1299_s0 = inlined_call_operand.hbm [shape: f32[16,256], index: 0, kind: input, shape index: {}]   ;;  %s1300_s1 = inlined_call_operand.hbm [shape: f32[256,256], index: 1, kind: input, shape index: {}]   ;;  %s1301_s2 = inlined_call_operand.vmem [shape: f32[1,256], index: 2, kind: input, shape index: {}]   ;;  %s1302_s3 = inlined_call_operand.hbm [shape: f32[256,256], index: 3, kind: input, shape index: {}]   ;;  %s1303_s4 = inlined_call_operand.vmem [shape: f32[1,256], index: 4, kind: input, shape index: {}]   ;;  %s1304_s5 = inlined_call_operand.hbm [shape: f32[256,256], index: 5, kind: input, shape index: {}]   ;;  %s1305_s6 = inlined_call_operand.vmem [shape: f32[1,256], index: 6, kind: input, shape index: {}]   ;;  %s1306_s7 = inlined_call_operand.hbm [shape: f32[16,128], index: 7, kind: output, shape index: {0}]   ;;  %s1307_s8 = inlined_call_operand.hbm [shape: f32[16,128], index: 8, kind: output, shape index: {1}]   ;;  %s1308_s9 = inlined_call_operand.hbm [shape: f32[16,256], index: 9, kind: output, shape index: {2}]  }
   0x1   :  { %16 = vsyncpa [#allocation6], 0 }
   0x2   :  { %17 = vsyncpa [#allocation9], 0 }
   0x3   :  { %18 = vsyncpa [#allocation4], 0 }
   0x4   :  { %19 = vsyncpa [#allocation12], 0  ;;  %s1010_s30 = smov [#allocation5]   ;;  %s1011_s11 = smov [#allocation2]  }
   0x5   :  { %s37_s10 = sshll.u32 %s1010_s30, 4  ;;  %s25_s12 = sshll.u32 %s1011_s11, 4  ;;  %s38_s10 = int_to_ptr.vmem [resolvable:$true] %s37_s10  ;;  %s1071_s12 = int_to_ptr.vmem [resolvable:$true] %s25_s12 }
   0x6   :  { %s846_s15 = scalar_lea.hbm %s1300_s1, 8192 }
   0x7   :  { %p847_p0 = scmp.ne.s32.totalorder %s1300_s1, %s846_s15  ;;  %p850_p1 = scmp.lt.u32.totalorder %s846_s15, %s1300_s1 }
   0x9   :  { %p852_p2 = pnand %p850_p1, %p847_p0 }
   0xb   :  { %855 = shalt.err (!%p852_p2)
}
   0xc   :  { %s856_s20 = scalar_lea.vmem %s38_s10, 8192  ;;  %p861_p4 = scmp.lt.s32.totalorder %s38_s10, %s38_s10 }
   0xd   :  { %p857_p3 = scmp.ne.s32.totalorder %s38_s10, %s856_s20  ;;  %p862_p5 = scmp.lt.s32.totalorder %s856_s20, %s856_s20 }
   0xf   :  { %p863_p6 = por %p862_p5, %p861_p4 }
  0x11   :  { %p864_p7 = pnand %p863_p6, %p857_p3 }
  0x13   :  { %867 = shalt.err (!%p864_p7)
}
  0x14   :  { %s1012_s21 = smov 256   ;;  %s1013_s22 = smov 16  }
  0x15   :  { %43 = dma.hbm_to_vmem [thread:$0]  %s1300_s1, 8192, %s38_s10, [#allocation6], %s1012_s21, %s1012_s21, %s1013_s22  }
  0x16   :  { %s868_s27 = scalar_lea.hbm %s1299_s0, 512 }
  0x17   :  { %p869_p8 = scmp.ne.s32.totalorder %s1299_s0, %s868_s27  ;;  %p872_p9 = scmp.lt.u32.totalorder %s868_s27, %s1299_s0 }
  0x19   :  { %p874_p10 = pnand %p872_p9, %p869_p8 }
  0x1b   :  { %877 = shalt.err (!%p874_p10)
}
  0x1c   :  { %s878_s13 = scalar_lea.vmem %s1071_s12, 512  ;;  %p883_p12 = scmp.lt.s32.totalorder %s1071_s12, %s1071_s12 }
  0x1d   :  { %p879_p11 = scmp.ne.s32.totalorder %s1071_s12, %s878_s13  ;;  %p884_p13 = scmp.lt.s32.totalorder %s878_s13, %s878_s13 }
  0x1f   :  { %p885_p0 = por %p884_p13, %p883_p12 }
  0x21   :  { %p886_p1 = pnand %p885_p0, %p879_p11 }
  0x23   :  { %889 = shalt.err (!%p886_p1)
}
  0x24   :  { %31 = dma.hbm_to_vmem [thread:$0]  %s1299_s0, 512, %s1071_s12, [#allocation3], %s1012_s21, %s1012_s21, %s1013_s22  }
  0x25   :  { %s1014_s14 = smov [#allocation7]   ;;  %s1015_s16 = smov [#allocation8]  }
  0x26   :  { %s51_s15 = sshll.u32 %s1014_s14, 4  ;;  %s65_s17 = sshll.u32 %s1015_s16, 4  ;;  %s52_s15 = int_to_ptr.vmem [resolvable:$true] %s51_s15  ;;  %s1108_s17 = int_to_ptr.vmem [resolvable:$true] %s65_s17 }
  0x27   :  { %s890_s20 = scalar_lea.hbm %s1302_s3, 8192 }
  0x28   :  { %p891_p2 = scmp.ne.s32.totalorder %s1302_s3, %s890_s20  ;;  %p894_p3 = scmp.lt.u32.totalorder %s890_s20, %s1302_s3 }
  0x2a   :  { %p896_p4 = pnand %p894_p3, %p891_p2 }
  0x2c   :  { %899 = shalt.err (!%p896_p4)
}
  0x2d   :  { %s900_s0 = scalar_lea.vmem %s52_s15, 8192  ;;  %p905_p6 = scmp.lt.s32.totalorder %s52_s15, %s52_s15 }
  0x2e   :  { %p901_p5 = scmp.ne.s32.totalorder %s52_s15, %s900_s0  ;;  %p906_p7 = scmp.lt.s32.totalorder %s900_s0, %s900_s0 }
  0x30   :  { %p907_p8 = por %p906_p7, %p905_p6 }
  0x32   :  { %p908_p9 = pnand %p907_p8, %p901_p5 }
  0x34   :  { %911 = shalt.err (!%p908_p9)
}
  0x35   :  { %57 = dma.hbm_to_vmem [thread:$0]  %s1302_s3, 8192, %s52_s15, [#allocation6], %s1012_s21, %s1012_s21, %s1013_s22  }
  0x36   :  { %s912_s30 = scalar_lea.hbm %s1304_s5, 8192 }
  0x37   :  { %p913_p10 = scmp.ne.s32.totalorder %s1304_s5, %s912_s30  ;;  %p916_p11 = scmp.lt.u32.totalorder %s912_s30, %s1304_s5 }
  0x39   :  { %p918_p12 = pnand %p916_p11, %p913_p10 }
  0x3b   :  { %921 = shalt.err (!%p918_p12)
}
  0x3c   :  { %s922_s14 = scalar_lea.vmem %s1108_s17, 8192  ;;  %p927_p0 = scmp.lt.s32.totalorder %s1108_s17, %s1108_s17 }
  0x3d   :  { %p923_p13 = scmp.ne.s32.totalorder %s1108_s17, %s922_s14  ;;  %p928_p1 = scmp.lt.s32.totalorder %s922_s14, %s922_s14 }
  0x3f   :  { %p929_p2 = por %p928_p1, %p927_p0 }
  0x41   :  { %p930_p3 = pnand %p929_p2, %p923_p13 }
  0x43   :  { %933 = shalt.err (!%p930_p3)
}
  0x44   :  { %71 = dma.hbm_to_vmem [thread:$0]  %s1304_s5, 8192, %s1108_s17, [#allocation9], %s1012_s21, %s1012_s21, %s1013_s22  }
  0x45   :  { %1000 = dma.done.wait [#allocation3], 512  }
  0x46   :  { %1001 = vsyncadd [#allocation3], 4294966784 }
  0x47   :  { %1002 = dma.done.wait [#allocation6], 16384  }
  0x48   :  { %1003 = vsyncadd [#allocation6], 4294950912 }
  0x49   :  { %1004 = dma.done.wait [#allocation9], 8192  }
  0x4a   :  { %1005 = vsyncadd [#allocation9], 4294959104  ;;  %v91_v0 = vld [vmem:[#allocation5 + $0x8] sm:$0xff]  ;;  %v93_v1 = vld [vmem:[#allocation5 + $0x18] sm:$0xff]  ;;  %s1017_s19 = smov [#allocation10]  }
  0x4b   :  { %v90_v2 = vld [vmem:[#allocation5] sm:$0xff]  ;;  %v611_v3 = vpack.c.bf16 %v93_v1, %v91_v0  ;;  %v92_v4 = vld [vmem:[#allocation5 + $0x10] sm:$0xff]  ;;  %v95_v5 = vld [vmem:[#allocation5 + $0x28] sm:$0xff]  ;;  %s566_s20 = sshll.u32 %s1017_s19, 4  ;;  %s567_s20 = int_to_ptr.vmem [resolvable:$true] %s566_s20 }
  0x4c   :  { %v97_v6 = vld [vmem:[#allocation5 + $0x38] sm:$0xff]  ;;  %v613_v7 = vpack.c.bf16 %v92_v4, %v90_v2  ;;  %v94_v9 = vld [vmem:[#allocation5 + $0x20] sm:$0xff]  ;;  %v96_v10 = vld [vmem:[#allocation5 + $0x30] sm:$0xff] }
  0x4d   :  { %v615_v8 = vpack.c.bf16 %v97_v6, %v95_v5  ;;  %v99_v11 = vld [vmem:[#allocation5 + $0x48] sm:$0xff]  ;;  %612 = vmatprep.subr.bf16.mxu0 %v611_v3  ;;  %v101_v12 = vld [vmem:[#allocation5 + $0x58] sm:$0xff]  ;;  %v617_v13 = vpack.c.bf16 %v96_v10, %v94_v9  ;;  %v98_v15 = vld [vmem:[#allocation5 + $0x40] sm:$0xff] }
  0x4e   :  { %614 = vmatpush1.bf16.msra.mxu0 %v613_v7  ;;  %v619_v14 = vpack.c.bf16 %v101_v12, %v99_v11  ;;  %v100_v16 = vld [vmem:[#allocation5 + $0x50] sm:$0xff]  ;;  %v103_v17 = vld [vmem:[#allocation5 + $0x68] sm:$0xff]  ;;  %v105_v18 = vld [vmem:[#allocation5 + $0x78] sm:$0xff] }
  0x4f   :  { %616 = vmatprep.subr.bf16.mxu0 %v615_v8  ;;  %v621_v19 = vpack.c.bf16 %v100_v16, %v98_v15  ;;  %v623_v20 = vpack.c.bf16 %v105_v18, %v103_v17  ;;  %v102_v21 = vld [vmem:[#allocation5 + $0x60] sm:$0xff]  ;;  %v104_v22 = vld [vmem:[#allocation5 + $0x70] sm:$0xff]  ;;  %v107_v23 = vld [vmem:[#allocation5 + $0x88] sm:$0xff] }
  0x50   :  { %v109_v24 = vld [vmem:[#allocation5 + $0x98] sm:$0xff]  ;;  %v625_v25 = vpack.c.bf16 %v104_v22, %v102_v21  ;;  %v106_v27 = vld [vmem:[#allocation5 + $0x80] sm:$0xff]  ;;  %v108_v28 = vld [vmem:[#allocation5 + $0x90] sm:$0xff] }
  0x51   :  { %v627_v26 = vpack.c.bf16 %v109_v24, %v107_v23  ;;  %v111_v29 = vld [vmem:[#allocation5 + $0xa8] sm:$0xff]  ;;  %v113_v30 = vld [vmem:[#allocation5 + $0xb8] sm:$0xff]  ;;  %v629_v31 = vpack.c.bf16 %v108_v28, %v106_v27  ;;  %v110_v33 = vld [vmem:[#allocation5 + $0xa0] sm:$0xff] }
  0x52   :  { %618 = vmatpush1.bf16.msra.mxu0 %v617_v13  ;;  %v631_v32 = vpack.c.bf16 %v113_v30, %v111_v29  ;;  %v112_v34 = vld [vmem:[#allocation5 + $0xb0] sm:$0xff]  ;;  %v115_v35 = vld [vmem:[#allocation5 + $0xc8] sm:$0xff]  ;;  %v117_v36 = vld [vmem:[#allocation5 + $0xd8] sm:$0xff] }
  0x53   :  { %620 = vmatprep.subr.bf16.mxu0 %v619_v14  ;;  %v633_v37 = vpack.c.bf16 %v112_v34, %v110_v33  ;;  %v635_v38 = vpack.c.bf16 %v117_v36, %v115_v35  ;;  %v114_v39 = vld [vmem:[#allocation5 + $0xc0] sm:$0xff]  ;;  %v116_v40 = vld [vmem:[#allocation5 + $0xd0] sm:$0xff]  ;;  %v87_v41 = vld [vmem:[#allocation2 + $0x8] sm:$0xff] }
  0x54   :  { %v119_v42 = vld [vmem:[#allocation5 + $0xe8] sm:$0xff]  ;;  %v121_v43 = vld [vmem:[#allocation5 + $0xf8] sm:$0xff]  ;;  %230 = vmatprep.mubr.f32.mxu0 %v87_v41  ;;  %v118_v45 = vld [vmem:[#allocation5 + $0xe0] sm:$0xff]  ;;  %v637_v50 = vpack.c.bf16 %v116_v40, %v114_v39 }
  0x55   :  { %v244_v44 = vld [vmem:[#allocation7 + $0x8] sm:$0xff]  ;;  %v120_v46 = vld [vmem:[#allocation5 + $0xf0] sm:$0xff]  ;;  %v246_v47 = vld [vmem:[#allocation7 + $0x18] sm:$0xff]  ;;  %v639_v56 = vpack.c.bf16 %v121_v43, %v119_v42 }
  0x56   :  { %622 = vmatpush1.bf16.msra.mxu0 %v621_v19  ;;  %v243_v48 = vld [vmem:[#allocation7] sm:$0xff]  ;;  %v245_v49 = vld [vmem:[#allocation7 + $0x10] sm:$0xff]  ;;  %v675_v51 = vpack.c.bf16 %v246_v47, %v244_v44  ;;  %v248_v53 = vld [vmem:[#allocation7 + $0x28] sm:$0xff]  ;;  %v641_v0 = vpack.c.bf16 %v120_v46, %v118_v45 }
  0x57   :  { %624 = vmatprep.subr.bf16.mxu0 %v623_v20  ;;  %v677_v52 = vpack.c.bf16 %v245_v49, %v243_v48  ;;  %v250_v54 = vld [vmem:[#allocation7 + $0x38] sm:$0xff]  ;;  %v247_v55 = vld [vmem:[#allocation7 + $0x20] sm:$0xff]  ;;  %v249_v58 = vld [vmem:[#allocation7 + $0x30] sm:$0xff] }
  0x58   :  { %v679_v57 = vpack.c.bf16 %v250_v54, %v248_v53  ;;  %v252_v59 = vld [vmem:[#allocation7 + $0x48] sm:$0xff]  ;;  %v254_v60 = vld [vmem:[#allocation7 + $0x58] sm:$0xff]  ;;  %676 = vmatprep.subr.bf16.mxu1 %v675_v51  ;;  %v681_v63 = vpack.c.bf16 %v249_v58, %v247_v55  ;;  %v122_v1 = vld [vmem:[#allocation5 + $0x100] sm:$0xff] }
  0x59   :  { %v123_v61 = vld [vmem:[#allocation5 + $0x108] sm:$0xff]  ;;  %v125_v62 = vld [vmem:[#allocation5 + $0x118] sm:$0xff]  ;;  %678 = vmatpush1.bf16.msra.mxu1 %v677_v52  ;;  %v683_v2 = vpack.c.bf16 %v254_v60, %v252_v59  ;;  %v251_v3 = vld [vmem:[#allocation7 + $0x40] sm:$0xff] }
  0x5a   :  { %626 = vmatpush1.bf16.msra.mxu0 %v625_v25  ;;  %680 = vmatprep.subr.bf16.mxu1 %v679_v57  ;;  %v253_v4 = vld [vmem:[#allocation7 + $0x50] sm:$0xff]  ;;  %v643_v5 = vpack.c.bf16 %v125_v62, %v123_v61  ;;  %v256_v7 = vld [vmem:[#allocation7 + $0x68] sm:$0xff]  ;;  %v258_v8 = vld [vmem:[#allocation7 + $0x78] sm:$0xff] }
  0x5b   :  { %628 = vmatprep.subr.bf16.mxu0 %v627_v26  ;;  %v124_v6 = vld [vmem:[#allocation5 + $0x110] sm:$0xff]  ;;  %v127_v9 = vld [vmem:[#allocation5 + $0x128] sm:$0xff]  ;;  %v129_v10 = vld [vmem:[#allocation5 + $0x138] sm:$0xff]  ;;  %v685_v11 = vpack.c.bf16 %v253_v4, %v251_v3  ;;  %v687_v14 = vpack.c.bf16 %v258_v8, %v256_v7 }
  0x5c   :  { %v645_v12 = vpack.c.bf16 %v124_v6, %v122_v1  ;;  %v126_v13 = vld [vmem:[#allocation5 + $0x120] sm:$0xff]  ;;  %v257_v16 = vld [vmem:[#allocation7 + $0x70] sm:$0xff]  ;;  %v647_v17 = vpack.c.bf16 %v129_v10, %v127_v9  ;;  %v260_v19 = vld [vmem:[#allocation7 + $0x88] sm:$0xff] }
  0x5d   :  { %682 = vmatpush1.bf16.msra.mxu1 %v681_v63  ;;  %v255_v15 = vld [vmem:[#allocation7 + $0x60] sm:$0xff]  ;;  %v128_v18 = vld [vmem:[#allocation5 + $0x130] sm:$0xff]  ;;  %v262_v20 = vld [vmem:[#allocation7 + $0x98] sm:$0xff] }
  0x5e   :  { %630 = vmatpush1.bf16.msra.mxu0 %v629_v31  ;;  %684 = vmatprep.subr.bf16.mxu1 %v683_v2  ;;  %v131_v21 = vld [vmem:[#allocation5 + $0x148] sm:$0xff]  ;;  %v133_v22 = vld [vmem:[#allocation5 + $0x158] sm:$0xff]  ;;  %v689_v23 = vpack.c.bf16 %v257_v16, %v255_v15  ;;  %v649_v24 = vpack.c.bf16 %v128_v18, %v126_v13  ;;  %v130_v25 = vld [vmem:[#allocation5 + $0x140] sm:$0xff]  ;;  %v691_v26 = vpack.c.bf16 %v262_v20, %v260_v19 }
  0x5f   :  { %632 = vmatprep.subr.bf16.mxu0 %v631_v32  ;;  %v259_v27 = vld [vmem:[#allocation7 + $0x80] sm:$0xff]  ;;  %v261_v28 = vld [vmem:[#allocation7 + $0x90] sm:$0xff]  ;;  %v651_v29 = vpack.c.bf16 %v133_v22, %v131_v21  ;;  %v264_v31 = vld [vmem:[#allocation7 + $0xa8] sm:$0xff] }
  0x60   :  { %v132_v30 = vld [vmem:[#allocation5 + $0x150] sm:$0xff]  ;;  %v266_v32 = vld [vmem:[#allocation7 + $0xb8] sm:$0xff]  ;;  %v135_v33 = vld [vmem:[#allocation5 + $0x168] sm:$0xff]  ;;  %v693_v35 = vpack.c.bf16 %v261_v28, %v259_v27 }
  0x61   :  { %686 = vmatpush1.bf16.msra.mxu1 %v685_v11  ;;  %v137_v34 = vld [vmem:[#allocation5 + $0x178] sm:$0xff]  ;;  %v653_v36 = vpack.c.bf16 %v132_v30, %v130_v25  ;;  %v263_v39 = vld [vmem:[#allocation7 + $0xa0] sm:$0xff]  ;;  %v265_v40 = vld [vmem:[#allocation7 + $0xb0] sm:$0xff] }
  0x62   :  { %634 = vmatpush1.bf16.msra.mxu0 %v633_v37  ;;  %688 = vmatprep.subr.bf16.mxu1 %v687_v14  ;;  %v134_v37 = vld [vmem:[#allocation5 + $0x160] sm:$0xff]  ;;  %v655_v41 = vpack.c.bf16 %v137_v34, %v135_v33  ;;  %v136_v42 = vld [vmem:[#allocation5 + $0x170] sm:$0xff]  ;;  %v268_v43 = vld [vmem:[#allocation7 + $0xc8] sm:$0xff]  ;;  %v697_v47 = vpack.c.bf16 %v265_v40, %v263_v39 }
  0x63   :  { %636 = vmatprep.subr.bf16.mxu0 %v635_v38  ;;  %v695_v38 = vpack.c.bf16 %v266_v32, %v264_v31  ;;  %v270_v44 = vld [vmem:[#allocation7 + $0xd8] sm:$0xff]  ;;  %v139_v45 = vld [vmem:[#allocation5 + $0x188] sm:$0xff]  ;;  %v657_v48 = vpack.c.bf16 %v136_v42, %v134_v37  ;;  %v138_v49 = vld [vmem:[#allocation5 + $0x180] sm:$0xff] }
  0x64   :  { %v141_v46 = vld [vmem:[#allocation5 + $0x198] sm:$0xff]  ;;  %v267_v51 = vld [vmem:[#allocation7 + $0xc0] sm:$0xff]  ;;  %v269_v52 = vld [vmem:[#allocation7 + $0xd0] sm:$0xff] }
  0x65   :  { %690 = vmatpush1.bf16.msra.mxu1 %v689_v23  ;;  %v659_v53 = vpack.c.bf16 %v141_v46, %v139_v45  ;;  %v140_v54 = vld [vmem:[#allocation5 + $0x190] sm:$0xff]  ;;  %v272_v55 = vld [vmem:[#allocation7 + $0xe8] sm:$0xff]  ;;  %v145_v58 = vld [vmem:[#allocation5 + $0x1b8] sm:$0xff]  ;;  %v701_v59 = vpack.c.bf16 %v269_v52, %v267_v51 }
  0x66   :  { %638 = vmatpush1.bf16.msra.mxu0 %v637_v50  ;;  %692 = vmatprep.subr.bf16.mxu1 %v691_v26  ;;  %v699_v50 = vpack.c.bf16 %v270_v44, %v268_v43  ;;  %v143_v57 = vld [vmem:[#allocation5 + $0x1a8] sm:$0xff]  ;;  %v661_v60 = vpack.c.bf16 %v140_v54, %v138_v49  ;;  %v142_v61 = vld [vmem:[#allocation5 + $0x1a0] sm:$0xff]  ;;  %v144_v2 = vld [vmem:[#allocation5 + $0x1b0] sm:$0xff] }
  0x67   :  { %640 = vmatprep.subr.bf16.mxu0 %v639_v56  ;;  %v274_v56 = vld [vmem:[#allocation7 + $0xf8] sm:$0xff]  ;;  %v271_v63 = vld [vmem:[#allocation7 + $0xe0] sm:$0xff]  ;;  %v663_v1 = vpack.c.bf16 %v145_v58, %v143_v57  ;;  %v276_v3 = vld [vmem:[#allocation7 + $0x108] sm:$0xff]  ;;  %v665_v8 = vpack.c.bf16 %v144_v2, %v142_v61 }
  0x68   :  { %v703_v62 = vpack.c.bf16 %v274_v56, %v272_v55  ;;  %v278_v4 = vld [vmem:[#allocation7 + $0x118] sm:$0xff]  ;;  %v146_v9 = vld [vmem:[#allocation5 + $0x1c0] sm:$0xff]  ;;  %v148_v14 = vld [vmem:[#allocation5 + $0x1d0] sm:$0xff] }
  0x69   :  { %694 = vmatpush1.bf16.msra.mxu1 %v693_v35  ;;  %v149_v6 = vld [vmem:[#allocation5 + $0x1d8] sm:$0xff]  ;;  %v707_v10 = vpack.c.bf16 %v278_v4, %v276_v3  ;;  %v275_v11 = vld [vmem:[#allocation7 + $0x100] sm:$0xff]  ;;  %v280_v15 = vld [vmem:[#allocation7 + $0x128] sm:$0xff]  ;;  %v669_v20 = vpack.c.bf16 %v148_v14, %v146_v9 }
  0x6a   :  { %642 = vmatpush1.bf16.msra.mxu0 %v641_v0  ;;  %696 = vmatprep.subr.bf16.mxu1 %v695_v38  ;;  %v273_v0 = vld [vmem:[#allocation7 + $0xf0] sm:$0xff]  ;;  %v282_v16 = vld [vmem:[#allocation7 + $0x138] sm:$0xff]  ;;  %v150_v21 = vld [vmem:[#allocation5 + $0x1e0] sm:$0xff] }
  0x6b   :  { %644 = vmatprep.subr.bf16.mxu0 %v643_v5  ;;  %v147_v5 = vld [vmem:[#allocation5 + $0x1c8] sm:$0xff]  ;;  %v705_v7 = vpack.c.bf16 %v273_v0, %v271_v63  ;;  %v153_v18 = vld [vmem:[#allocation5 + $0x1f8] sm:$0xff]  ;;  %v711_v22 = vpack.c.bf16 %v282_v16, %v280_v15  ;;  %v279_v23 = vld [vmem:[#allocation7 + $0x120] sm:$0xff] }
  0x6c   :  { %v667_v13 = vpack.c.bf16 %v149_v6, %v147_v5  ;;  %v152_v26 = vld [vmem:[#allocation5 + $0x1f0] sm:$0xff]  ;;  %v284_v27 = vld [vmem:[#allocation7 + $0x148] sm:$0xff]  ;;  %v286_v28 = vld [vmem:[#allocation7 + $0x158] sm:$0xff] }
  0x6d   :  { %698 = vmatpush1.bf16.msra.mxu1 %v697_v47  ;;  %v673_v30 = vpack.c.bf16 %v152_v26, %v150_v21  ;;  %v715_v31 = vpack.c.bf16 %v286_v28, %v284_v27  ;;  %v283_v32 = vld [vmem:[#allocation7 + $0x140] sm:$0xff]  ;;  %v285_v33 = vld [vmem:[#allocation7 + $0x150] sm:$0xff]  ;;  %v288_v34 = vld [vmem:[#allocation7 + $0x168] sm:$0xff] }
  0x6e   :  { %646 = vmatpush1.bf16.msra.mxu0 %v645_v12  ;;  %700 = vmatprep.subr.bf16.mxu1 %v699_v50  ;;  %v277_v12 = vld [vmem:[#allocation7 + $0x110] sm:$0xff]  ;;  %v290_v35 = vld [vmem:[#allocation7 + $0x178] sm:$0xff]  ;;  %v86_v37 = vld [vmem:[#allocation2] sm:$0xff] }
  0x6f   :  { %648 = vmatprep.subr.bf16.mxu0 %v647_v17  ;;  %v151_v17 = vld [vmem:[#allocation5 + $0x1e8] sm:$0xff]  ;;  %v709_v19 = vpack.c.bf16 %v277_v12, %v275_v11  ;;  %v719_v38 = vpack.c.bf16 %v290_v35, %v288_v34  ;;  %v287_v39 = vld [vmem:[#allocation7 + $0x160] sm:$0xff]  ;;  %v289_v40 = vld [vmem:[#allocation7 + $0x170] sm:$0xff] }
  0x70   :  { %v671_v25 = vpack.c.bf16 %v153_v18, %v151_v17  ;;  %v292_v42 = vld [vmem:[#allocation7 + $0x188] sm:$0xff]  ;;  %v294_v43 = vld [vmem:[#allocation7 + $0x198] sm:$0xff]  ;;  %v721_v44 = vpack.c.bf16 %v289_v40, %v287_v39  ;;  %v88_v45 = vld [vmem:[#allocation2 + $0x10] sm:$0xff] }
  0x71   :  { %702 = vmatpush1.bf16.msra.mxu1 %v701_v59  ;;  %v723_v46 = vpack.c.bf16 %v294_v43, %v292_v42  ;;  %v291_v47 = vld [vmem:[#allocation7 + $0x180] sm:$0xff]  ;;  %v296_v49 = vld [vmem:[#allocation7 + $0x1a8] sm:$0xff]  ;;  %v298_v50 = vld [vmem:[#allocation7 + $0x1b8] sm:$0xff] }
  0x72   :  { %650 = vmatpush1.bf16.msra.mxu0 %v649_v24  ;;  %704 = vmatprep.subr.bf16.mxu1 %v703_v62  ;;  %v281_v24 = vld [vmem:[#allocation7 + $0x130] sm:$0xff]  ;;  %v727_v52 = vpack.c.bf16 %v298_v50, %v296_v49  ;;  %v300_v55 = vld [vmem:[#allocation7 + $0x1c8] sm:$0xff]  ;;  %v302_v56 = vld [vmem:[#allocation7 + $0x1d8] sm:$0xff] }
  0x73   :  { %652 = vmatprep.subr.bf16.mxu0 %v651_v29  ;;  %v713_v29 = vpack.c.bf16 %v281_v24, %v279_v23  ;;  %v297_v54 = vld [vmem:[#allocation7 + $0x1b0] sm:$0xff]  ;;  %v731_v58 = vpack.c.bf16 %v302_v56, %v300_v55  ;;  %v299_v59 = vld [vmem:[#allocation7 + $0x1c0] sm:$0xff]  ;;  %v304_v62 = vld [vmem:[#allocation7 + $0x1e8] sm:$0xff] }
  0x74   :  { %v306_v63 = vld [vmem:[#allocation7 + $0x1f8] sm:$0xff]  ;;  %v305_v2 = vld [vmem:[#allocation7 + $0x1f0] sm:$0xff]  ;;  %v401_v4 = vld [vmem:[#allocation8 + $0x8] sm:$0xff] }
  0x75   :  { %706 = vmatpush1.bf16.msra.mxu1 %v705_v7  ;;  %v735_v0 = vpack.c.bf16 %v306_v63, %v304_v62  ;;  %v403_v5 = vld [vmem:[#allocation8 + $0x18] sm:$0xff]  ;;  %v400_v6 = vld [vmem:[#allocation8] sm:$0xff]  ;;  %v405_v9 = vld [vmem:[#allocation8 + $0x28] sm:$0xff] }
  0x76   :  { %654 = vmatpush1.bf16.msra.mxu0 %v653_v36  ;;  %708 = vmatprep.subr.bf16.mxu1 %v707_v10  ;;  %v717_v36 = vpack.c.bf16 %v285_v33, %v283_v32  ;;  %v739_v7 = vpack.c.bf16 %v403_v5, %v401_v4  ;;  %v407_v10 = vld [vmem:[#allocation8 + $0x38] sm:$0xff]  ;;  %v406_v14 = vld [vmem:[#allocation8 + $0x30] sm:$0xff]  ;;  %v409_v15 = vld [vmem:[#allocation8 + $0x48] sm:$0xff] }
  0x77   :  { %656 = vmatprep.subr.bf16.mxu0 %v655_v41  ;;  %v89_v41 = vld [vmem:[#allocation2 + $0x18] sm:$0xff]  ;;  %v1147_v12 = vpack.c.bf16 %v407_v10, %v405_v9  ;;  %v413_v21 = vld [vmem:[#allocation8 + $0x68] sm:$0xff]  ;;  %v414_v26 = vld [vmem:[#allocation8 + $0x70] sm:$0xff] }
  0x78   :  { %v411_v16 = vld [vmem:[#allocation8 + $0x58] sm:$0xff]  ;;  %v417_v27 = vld [vmem:[#allocation8 + $0x88] sm:$0xff]  ;;  %v418_v32 = vld [vmem:[#allocation8 + $0x90] sm:$0xff] }
  0x79   :  { %710 = vmatpush1.bf16.msra.mxu1 %v709_v19  ;;  %v1153_v18 = vpack.c.bf16 %v411_v16, %v409_v15  ;;  %v408_v19 = vld [vmem:[#allocation8 + $0x40] sm:$0xff]  ;;  %v419_v28 = vld [vmem:[#allocation8 + $0x98] sm:$0xff]  ;;  %v421_v33 = vld [vmem:[#allocation8 + $0xa8] sm:$0xff] }
  0x7a   :  { %658 = vmatpush1.bf16.msra.mxu0 %v657_v48  ;;  %712 = vmatprep.subr.bf16.mxu1 %v711_v22  ;;  %v293_v48 = vld [vmem:[#allocation7 + $0x190] sm:$0xff]  ;;  %v415_v22 = vld [vmem:[#allocation8 + $0x78] sm:$0xff]  ;;  %v425_v39 = vld [vmem:[#allocation8 + $0xc8] sm:$0xff] }
  0x7b   :  { %660 = vmatprep.subr.bf16.mxu0 %v659_v53  ;;  %v725_v51 = vpack.c.bf16 %v293_v48, %v291_v47  ;;  %v295_v53 = vld [vmem:[#allocation7 + $0x1a0] sm:$0xff]  ;;  %v1159_v24 = vpack.c.bf16 %v415_v22, %v413_v21  ;;  %v423_v34 = vld [vmem:[#allocation8 + $0xb8] sm:$0xff]  ;;  %v430_v50 = vld [vmem:[#allocation8 + $0xf0] sm:$0xff] }
  0x7c   :  { %v729_v57 = vpack.c.bf16 %v297_v54, %v295_v53  ;;  %v427_v40 = vld [vmem:[#allocation8 + $0xd8] sm:$0xff]  ;;  %v424_v43 = vld [vmem:[#allocation8 + $0xc0] sm:$0xff]  ;;  %v434_v56 = vld [vmem:[#allocation8 + $0x110] sm:$0xff] }
  0x7d   :  { %714 = vmatpush1.bf16.msra.mxu1 %v713_v29  ;;  %v1177_v42 = vpack.c.bf16 %v427_v40, %v425_v39  ;;  %v428_v49 = vld [vmem:[#allocation8 + $0xe0] sm:$0xff]  ;;  %v438_v62 = vld [vmem:[#allocation8 + $0x130] sm:$0xff]  ;;  %v441_v63 = vld [vmem:[#allocation8 + $0x148] sm:$0xff] }
  0x7e   :  { %662 = vmatpush1.bf16.msra.mxu0 %v661_v60  ;;  %716 = vmatprep.subr.bf16.mxu1 %v715_v31  ;;  %v301_v60 = vld [vmem:[#allocation7 + $0x1d0] sm:$0xff]  ;;  %v416_v31 = vld [vmem:[#allocation8 + $0x80] sm:$0xff]  ;;  %v1186_v53 = vpack.c.bf16 %v430_v50, %v428_v49  ;;  %v445_v5 = vld [vmem:[#allocation8 + $0x168] sm:$0xff] }
  0x7f   :  { %664 = vmatprep.subr.bf16.mxu0 %v663_v1  ;;  %v733_v61 = vpack.c.bf16 %v301_v60, %v299_v59  ;;  %v303_v1 = vld [vmem:[#allocation7 + $0x1e0] sm:$0xff]  ;;  %v1168_v35 = vpack.c.bf16 %v418_v32, %v416_v31  ;;  %v442_v4 = vld [vmem:[#allocation8 + $0x150] sm:$0xff]  ;;  %v453_v21 = vld [vmem:[#allocation8 + $0x1a8] sm:$0xff] }
  0x80   :  { %v737_v3 = vpack.c.bf16 %v305_v2, %v303_v1  ;;  %v432_v55 = vld [vmem:[#allocation8 + $0x100] sm:$0xff]  ;;  %v446_v10 = vld [vmem:[#allocation8 + $0x170] sm:$0xff]  ;;  %v455_v22 = vld [vmem:[#allocation8 + $0x1b8] sm:$0xff] }
  0x81   :  { %718 = vmatpush1.bf16.msra.mxu1 %v717_v36  ;;  %v1171_v36 = vpack.c.bf16 %v423_v34, %v421_v33  ;;  %v1192_v59 = vpack.c.bf16 %v434_v56, %v432_v55  ;;  %v444_v9 = vld [vmem:[#allocation8 + $0x160] sm:$0xff]  ;;  %v457_v31 = vld [vmem:[#allocation8 + $0x1c8] sm:$0xff]  ;;  %v459_v32 = vld [vmem:[#allocation8 + $0x1d8] sm:$0xff] }
  0x82   :  { %666 = vmatpush1.bf16.msra.mxu0 %v665_v8  ;;  %720 = vmatprep.subr.bf16.mxu1 %v719_v38  ;;  %v402_v8 = vld [vmem:[#allocation8 + $0x10] sm:$0xff]  ;;  %v1210_v15 = vpack.c.bf16 %v446_v10, %v444_v9  ;;  %v795_v34 = vpack.c.bf16 %v459_v32, %v457_v31  ;;  %v154_v40 = vld [vmem:[%s1301_s2] sm:$0x3] }
  0x83   :  { %668 = vmatprep.subr.bf16.mxu0 %v667_v13  ;;  %v1145_v11 = vpack.c.bf16 %v402_v8, %v400_v6  ;;  %v404_v13 = vld [vmem:[#allocation8 + $0x20] sm:$0xff]  ;;  %v422_v38 = vld [vmem:[#allocation8 + $0xb0] sm:$0xff]  ;;  %v447_v6 = vld [vmem:[#allocation8 + $0x178] sm:$0xff] }
  0x84   :  { %v1150_v17 = vpack.c.bf16 %v406_v14, %v404_v13  ;;  %v1207_v8 = vpack.c.bf16 %v447_v6, %v445_v5  ;;  %v449_v13 = vld [vmem:[#allocation8 + $0x188] sm:$0xff]  ;;  %v451_v14 = vld [vmem:[#allocation8 + $0x198] sm:$0xff] }
  0x85   :  { %722 = vmatpush1.bf16.msra.mxu1 %v721_v44  ;;  %v426_v44 = vld [vmem:[#allocation8 + $0xd0] sm:$0xff]  ;;  %v1213_v16 = vpack.c.bf16 %v451_v14, %v449_v13 }
  0x86   :  { %670 = vmatpush1.bf16.msra.mxu0 %v669_v20  ;;  %724 = vmatprep.subr.bf16.mxu1 %v723_v46  ;;  %v410_v20 = vld [vmem:[#allocation8 + $0x50] sm:$0xff]  ;;  %v431_v46 = vld [vmem:[#allocation8 + $0xf8] sm:$0xff]  ;;  %v1180_v47 = vpack.c.bf16 %v426_v44, %v424_v43 }
  0x87   :  { %672 = vmatprep.subr.bf16.mxu0 %v671_v25  ;;  %v1156_v23 = vpack.c.bf16 %v410_v20, %v408_v19  ;;  %v412_v25 = vld [vmem:[#allocation8 + $0x60] sm:$0xff]  ;;  %v450_v20 = vld [vmem:[#allocation8 + $0x190] sm:$0xff] }
  0x88   :  { %v1162_v29 = vpack.c.bf16 %v414_v26, %v412_v25  ;;  %v448_v19 = vld [vmem:[#allocation8 + $0x180] sm:$0xff]  ;;  %v791_v26 = vpack.c.bf16 %v455_v22, %v453_v21 }
  0x89   :  { %726 = vmatpush1.bf16.msra.mxu1 %v725_v51  ;;  %v433_v51 = vld [vmem:[#allocation8 + $0x108] sm:$0xff]  ;;  %v789_v25 = vpack.c.bf16 %v450_v20, %v448_v19 }
  0x8a   :  { %674 = vmatpush1.bf16.msra.mxu0 %v673_v30  ;;  %728 = vmatprep.subr.bf16.mxu1 %v727_v52  ;;  %v1165_v30 = vpack.c.bf16 %v419_v28, %v417_v27  ;;  %v435_v52 = vld [vmem:[#allocation8 + $0x118] sm:$0xff]  ;;  %v452_v27 = vld [vmem:[#allocation8 + $0x1a0] sm:$0xff]  ;;  %v454_v28 = vld [vmem:[#allocation8 + $0x1b0] sm:$0xff] }
  0x8b   :  { %740 = vmatprep.subr.bf16.mxu0 %v739_v7  ;;  %v1189_v54 = vpack.c.bf16 %v435_v52, %v433_v51  ;;  %v793_v33 = vpack.c.bf16 %v454_v28, %v452_v27 }
  0x8d   :  { %231 = vmatmul.mubr.f32.vlgmr.msra.gmra.mrb[0].mxu0 %v86_v37  ;;  %730 = vmatpush1.bf16.msra.mxu1 %v729_v57  ;;  %v420_v37 = vld [vmem:[#allocation8 + $0xa0] sm:$0xff]  ;;  %v437_v57 = vld [vmem:[#allocation8 + $0x128] sm:$0xff] }
  0x8e   :  { %236 = vmatprep.mubr.f32.mxu0 %v89_v41  ;;  %732 = vmatprep.subr.bf16.mxu1 %v731_v58  ;;  %v1174_v41 = vpack.c.bf16 %v422_v38, %v420_v37  ;;  %v439_v58 = vld [vmem:[#allocation8 + $0x138] sm:$0xff]  ;;  %v156_v37 = vlaneseq }
  0x8f   :  { %742 = vmatpush1.bf16.msra.mxu0 %v1145_v11  ;;  %v1195_v60 = vpack.c.bf16 %v439_v58, %v437_v57 }
  0x90   :  { %744 = vmatprep.subr.bf16.mxu0 %v1147_v12  ;;  %v157_v38 = vshrl.u32 %v156_v37, 7 }
  0x91   :  { %237 = vmatmul.mubr.f32.gmra.mrb[2].mxu0 %v88_v45  ;;  %734 = vmatpush1.bf16.msra.mxu1 %v733_v61  ;;  %v429_v45 = vld [vmem:[#allocation8 + $0xe8] sm:$0xff]  ;;  %v436_v61 = vld [vmem:[#allocation8 + $0x120] sm:$0xff] }
  0x92   :  { %736 = vmatprep.subr.bf16.mxu1 %v735_v0  ;;  %v1183_v48 = vpack.c.bf16 %v431_v46, %v429_v45  ;;  %v443_v0 = vld [vmem:[#allocation8 + $0x158] sm:$0xff]  ;;  %v1198_v1 = vpack.c.bf16 %v438_v62, %v436_v61  ;;  %v1217_v39 = vsub.s32 0, %v157_v38  ;;  %v1222_v43 = vsub.s32 1, %v157_v38 }
  0x93   :  { %746 = vmatpush1.bf16.msra.mxu0 %v1150_v17  ;;  %v1201_v2 = vpack.c.bf16 %v443_v0, %v441_v63 }
  0x94   :  { %748 = vmatprep.subr.bf16.mxu0 %v1153_v18  ;;  %v159_v44 = vrot.slane %v154_v40, %v1217_v39  ;;  %v163_v45 = vrot.slane %v154_v40, %v1222_v43 }
  0x95   :  { %738 = vmatpush1.bf16.msra.mxu1 %v737_v3  ;;  %v440_v3 = vld [vmem:[#allocation8 + $0x140] sm:$0xff] }
  0x96   :  { %803 = vmatprep.subr.bf16.mxu1 %v739_v7  ;;  %v1204_v7 = vpack.c.bf16 %v442_v4, %v440_v3 }
  0x97   :  { %750 = vmatpush1.bf16.msra.mxu0 %v1156_v23 }
  0x98   :  { %752 = vmatprep.subr.bf16.mxu0 %v1159_v24 }
  0x9b   :  { %754 = vmatpush1.bf16.msra.mxu0 %v1162_v29 }
  0x9c   :  { %756 = vmatprep.subr.bf16.mxu0 %v1165_v30 }
  0x9f   :  { %758 = vmatpush1.bf16.msra.mxu0 %v1168_v35 }
  0xa0   :  { %760 = vmatprep.subr.bf16.mxu0 %v1171_v36 }
  0xa3   :  { %762 = vmatpush1.bf16.msra.mxu0 %v1174_v41 }
  0xa4   :  { %764 = vmatprep.subr.bf16.mxu0 %v1177_v42 }
  0xa7   :  { %766 = vmatpush1.bf16.msra.mxu0 %v1180_v47 }
  0xa8   :  { %768 = vmatprep.subr.bf16.mxu0 %v1183_v48 }
  0xab   :  { %770 = vmatpush1.bf16.msra.mxu0 %v1186_v53 }
  0xac   :  { %772 = vmatprep.subr.bf16.mxu0 %v1189_v54 }
  0xaf   :  { %774 = vmatpush1.bf16.msra.mxu0 %v1192_v59 }
  0xb0   :  { %776 = vmatprep.subr.bf16.mxu0 %v1195_v60 }
  0xb3   :  { %778 = vmatpush1.bf16.msra.mxu0 %v1198_v1 }
  0xb4   :  { %780 = vmatprep.subr.bf16.mxu0 %v1201_v2 }
  0xb7   :  { %782 = vmatpush1.bf16.msra.mxu0 %v1204_v7 }
  0xb8   :  { %784 = vmatprep.subr.bf16.mxu0 %v1207_v8 }
  0xbb   :  { %786 = vmatpush1.bf16.msra.mxu0 %v1210_v15 }
  0xbc   :  { %788 = vmatprep.subr.bf16.mxu0 %v1213_v16 }
  0xbf   :  { %790 = vmatpush1.bf16.msra.mxu0 %v789_v25 }
  0xc0   :  { %792 = vmatprep.subr.bf16.mxu0 %v791_v26 }
  0xc3   :  { %794 = vmatpush1.bf16.msra.mxu0 %v793_v33 }
  0xc4   :  { %796 = vmatprep.subr.bf16.mxu0 %v795_v34 }
 0x160   :  { %v232_v46 = vpop.f32.mrb[0].mxu0 }
 0x161   :  { %v233_v49 = vadd.f32 %v232_v46, %v159_v44  ;;  %v234_v50 = vpop.f32.mrb[1].mxu0 }
 0x162   :  { %v235_v51 = vadd.f32 %v234_v50, %v163_v45 }
 0x163   :  { %553 = vst [vmem:[#allocation10] sm:$0xff] %v233_v49 }
 0x164   :  { %555 = vst [vmem:[#allocation11] sm:$0xff] %v235_v51  ;;  %v238_v52 = vpop.f32.mrb[2].mxu0  ;;  %383 = vmatprep.mubr.f32.mxu1 %v235_v51 }
 0x165   :  { %v239_v55 = vadd.f32 %v238_v52, %v159_v44  ;;  %v240_v56 = vpop.f32.mrb[3].mxu0  ;;  %384 = vmatmul.mubr.f32.vlgmr.msra.gmra.mrb[0].mxu1 %v233_v49 }
 0x166   :  { %v241_v57 = vadd.f32 %v240_v56, %v163_v45  ;;  %819 = vmatpush1.bf16.msra.mxu1 %v1145_v11  ;;  %v456_v11 = vld [vmem:[#allocation8 + $0x1c0] sm:$0xff] }
 0x167   :  { %554 = vst [vmem:[#allocation10 + $0x8] sm:$0xff] %v239_v55  ;;  %804 = vmatprep.subr.bf16.mxu1 %v1147_v12  ;;  %v458_v12 = vld [vmem:[#allocation8 + $0x1d0] sm:$0xff] }
 0x168   :  { %556 = vst [vmem:[#allocation11 + $0x8] sm:$0xff] %v241_v57  ;;  %389 = vmatprep.mubr.f32.mxu1 %v241_v57 }
 0x169   :  { %390 = vmatmul.mubr.f32.gmra.mrb[2].mxu1 %v239_v55 }
 0x16a   :  { %820 = vmatpush1.bf16.msra.mxu1 %v1150_v17  ;;  %v797_v17 = vpack.c.bf16 %v458_v12, %v456_v11 }
 0x16b   :  { %805 = vmatprep.subr.bf16.mxu1 %v1153_v18  ;;  %v461_v18 = vld [vmem:[#allocation8 + $0x1e8] sm:$0xff] }
 0x16c   :  { %798 = vmatpush1.bf16.msra.mxu0 %v797_v17 }
 0x16e   :  { %821 = vmatpush1.bf16.msra.mxu1 %v1156_v23  ;;  %v463_v23 = vld [vmem:[#allocation8 + $0x1f8] sm:$0xff] }
 0x16f   :  { %806 = vmatprep.subr.bf16.mxu1 %v1159_v24  ;;  %v799_v24 = vpack.c.bf16 %v463_v23, %v461_v18 }
 0x171   :  { %800 = vmatprep.subr.bf16.mxu0 %v799_v24 }
 0x172   :  { %822 = vmatpush1.bf16.msra.mxu1 %v1162_v29  ;;  %v460_v29 = vld [vmem:[#allocation8 + $0x1e0] sm:$0xff] }
 0x173   :  { %807 = vmatprep.subr.bf16.mxu1 %v1165_v30  ;;  %v462_v30 = vld [vmem:[#allocation8 + $0x1f0] sm:$0xff] }
 0x176   :  { %823 = vmatpush1.bf16.msra.mxu1 %v1168_v35  ;;  %v801_v35 = vpack.c.bf16 %v462_v30, %v460_v29 }
 0x177   :  { %808 = vmatprep.subr.bf16.mxu1 %v1171_v36  ;;  %v307_v36 = vld [vmem:[%s1303_s4] sm:$0x3]  ;;  %s1016_s4 = smov [#allocation11]  }
 0x178   :  { %802 = vmatpush1.bf16.msra.mxu0 %v801_v35  ;;  %s578_s18 = sshll.u32 %s1016_s4, 4  ;;  %s579_s18 = int_to_ptr.vmem [resolvable:$true] %s578_s18 }
 0x179   :  { %s934_s23 = scalar_lea.vmem %s579_s18, 256  ;;  %p939_p5 = scmp.lt.s32.totalorder %s579_s18, %s579_s18 }
 0x17a   :  { %824 = vmatpush1.bf16.msra.mxu1 %v1174_v41  ;;  %v312_v41 = vrot.slane %v307_v36, %v1217_v39  ;;  %p935_p4 = scmp.ne.s32.totalorder %s579_s18, %s934_s23  ;;  %p940_p6 = scmp.lt.s32.totalorder %s934_s23, %s934_s23 }
 0x17b   :  { %809 = vmatprep.subr.bf16.mxu1 %v1177_v42  ;;  %v316_v42 = vrot.slane %v307_v36, %v1222_v43 }
 0x17c   :  { %p941_p7 = por %p940_p6, %p939_p5 }
 0x17e   :  { %825 = vmatpush1.bf16.msra.mxu1 %v1180_v47  ;;  %p942_p8 = pnand %p941_p7, %p935_p4 }
 0x17f   :  { %810 = vmatprep.subr.bf16.mxu1 %v1183_v48 }
 0x182   :  { %826 = vmatpush1.bf16.msra.mxu1 %v1186_v53 }
 0x183   :  { %811 = vmatprep.subr.bf16.mxu1 %v1189_v54 }
 0x186   :  { %827 = vmatpush1.bf16.msra.mxu1 %v1192_v59 }
 0x187   :  { %812 = vmatprep.subr.bf16.mxu1 %v1195_v60 }
 0x18a   :  { %828 = vmatpush1.bf16.msra.mxu1 %v1198_v1 }
 0x18b   :  { %813 = vmatprep.subr.bf16.mxu1 %v1201_v2 }
 0x18e   :  { %829 = vmatpush1.bf16.msra.mxu1 %v1204_v7 }
 0x18f   :  { %814 = vmatprep.subr.bf16.mxu1 %v1207_v8 }
 0x192   :  { %830 = vmatpush1.bf16.msra.mxu1 %v1210_v15 }
 0x193   :  { %815 = vmatprep.subr.bf16.mxu1 %v1213_v16 }
 0x196   :  { %831 = vmatpush1.bf16.msra.mxu1 %v789_v25 }
 0x197   :  { %816 = vmatprep.subr.bf16.mxu1 %v791_v26 }
 0x19a   :  { %832 = vmatpush1.bf16.msra.mxu1 %v793_v33 }
 0x19b   :  { %817 = vmatprep.subr.bf16.mxu1 %v795_v34 }
 0x19e   :  { %833 = vmatpush1.bf16.msra.mxu1 %v797_v17 }
 0x19f   :  { %818 = vmatprep.subr.bf16.mxu1 %v799_v24 }
 0x1a2   :  { %834 = vmatpush1.bf16.msra.mxu1 %v801_v35 }
 0x238   :  { %v385_v47 = vpop.f32.mrb[0].mxu1 }
 0x239   :  { %v386_v48 = vadd.f32 %v385_v47, %v312_v41  ;;  %v387_v53 = vpop.f32.mrb[1].mxu1 }
 0x23a   :  { %v388_v54 = vadd.f32 %v387_v53, %v316_v42 }
 0x23b   :  { %v396_v60 = vmax.f32 %v386_v48, 0.0 }
 0x23c   :  { %v397_v58 = vmax.f32 %v388_v54, 0.0  ;;  %v391_v59 = vpop.f32.mrb[2].mxu1 }
 0x23d   :  { %v392_v61 = vadd.f32 %v391_v59, %v312_v41  ;;  %v393_v62 = vpop.f32.mrb[3].mxu1 }
 0x23e   :  { %v394_v63 = vadd.f32 %v393_v62, %v316_v42  ;;  %540 = vmatprep.mubr.f32.mxu0 %v397_v58 }
 0x23f   :  { %541 = vmatmul.mubr.f32.vlgmr.msra.gmra.mrb[4].mxu0 %v396_v60  ;;  %v398_v1 = vmax.f32 %v392_v61, 0.0 }
 0x240   :  { %v399_v0 = vmax.f32 %v394_v63, 0.0 }
 0x242   :  { %546 = vmatprep.mubr.f32.mxu1 %v399_v0 }
 0x243   :  { %547 = vmatmul.mubr.f32.vlgmr.msra.gmra.mrb[4].mxu1 %v398_v1 }
 0x244   :  { %945 = shalt.err (!%p942_p8)
}
 0x245   :  { %s946_s26 = scalar_lea.hbm %s1307_s8, 256 }
 0x246   :  { %p947_p9 = scmp.ne.s32.totalorder %s1307_s8, %s946_s26  ;;  %p950_p10 = scmp.lt.u32.totalorder %s946_s26, %s1307_s8 }
 0x248   :  { %p952_p11 = pnand %p950_p10, %p947_p9 }
 0x24a   :  { %955 = shalt.err (!%p952_p11)
}
 0x24b   :  { %s1018_s29 = smov 128   ;;  %s1019_s30 = smov 8  }
 0x24c   :  { %584 = dma.vmem_to_hbm [thread:$0]  %s579_s18, 256, %s1307_s8, [#allocation12], %s1018_s29, %s1018_s29, %s1019_s30  }
 0x24d   :  { %s956_s1 = scalar_lea.vmem %s567_s20, 256  ;;  %p961_p13 = scmp.lt.s32.totalorder %s567_s20, %s567_s20 }
 0x24e   :  { %p957_p12 = scmp.ne.s32.totalorder %s567_s20, %s956_s1  ;;  %p962_p0 = scmp.lt.s32.totalorder %s956_s1, %s956_s1 }
 0x250   :  { %p963_p1 = por %p962_p0, %p961_p13 }
 0x252   :  { %p964_p2 = pnand %p963_p1, %p957_p12 }
 0x254   :  { %967 = shalt.err (!%p964_p2)
}
 0x255   :  { %s968_s3 = scalar_lea.hbm %s1306_s7, 256 }
 0x256   :  { %p969_p3 = scmp.ne.s32.totalorder %s1306_s7, %s968_s3  ;;  %p972_p4 = scmp.lt.u32.totalorder %s968_s3, %s1306_s7 }
 0x258   :  { %p974_p5 = pnand %p972_p4, %p969_p3 }
 0x25a   :  { %977 = shalt.err (!%p974_p5)
}
 0x25b   :  { %572 = dma.vmem_to_hbm [thread:$0]  %s567_s20, 256, %s1306_s7, [#allocation4], %s1018_s29, %s1018_s29, %s1019_s30  }
 0x25c   :  { %v464_v2 = vld [vmem:[%s1305_s6] sm:$0x3]  ;;  %s1020_s19 = smov [#allocation13]  }
 0x25d   :  { %v469_v3 = vrot.slane %v464_v2, %v1217_v39  ;;  %v473_v4 = vrot.slane %v464_v2, %v1222_v43  ;;  %s590_s23 = sshll.u32 %s1020_s19, 4  ;;  %s591_s23 = int_to_ptr.vmem [resolvable:$true] %s590_s23 }
 0x25e   :  { %s978_s6 = scalar_lea.vmem %s591_s23, 512  ;;  %p983_p7 = scmp.lt.s32.totalorder %s591_s23, %s591_s23 }
 0x25f   :  { %p979_p6 = scmp.ne.s32.totalorder %s591_s23, %s978_s6  ;;  %p984_p8 = scmp.lt.s32.totalorder %s978_s6, %s978_s6 }
 0x261   :  { %p985_p9 = por %p984_p8, %p983_p7 }
 0x263   :  { %p986_p10 = pnand %p985_p9, %p979_p6 }
 0x312   :  { %v542_v5 = vpop.f32.mrb[4].mxu0 }
 0x313   :  { %v543_v6 = vadd.f32 %v542_v5, %v469_v3  ;;  %v544_v7 = vpop.f32.mrb[5].mxu0 }
 0x314   :  { %v545_v8 = vadd.f32 %v544_v7, %v473_v4 }
 0x315   :  { %557 = vst [vmem:[#allocation13] sm:$0xff] %v543_v6 }
 0x316   :  { %558 = vst [vmem:[#allocation13 + $0x8] sm:$0xff] %v545_v8  ;;  %v548_v9 = vpop.f32.mrb[4].mxu1 }
 0x317   :  { %v549_v10 = vadd.f32 %v548_v9, %v469_v3  ;;  %v550_v13 = vpop.f32.mrb[5].mxu1 }
 0x318   :  { %v551_v14 = vadd.f32 %v550_v13, %v473_v4 }
 0x319   :  { %559 = vst [vmem:[#allocation13 + $0x10] sm:$0xff] %v549_v10 }
 0x31a   :  { %560 = vst [vmem:[#allocation13 + $0x18] sm:$0xff] %v551_v14 }
 0x31b   :  { %989 = shalt.err (!%p986_p10)
}
 0x31c   :  { %s990_s24 = scalar_lea.hbm %s1308_s9, 512 }
 0x31d   :  { %p991_p11 = scmp.ne.s32.totalorder %s1308_s9, %s990_s24  ;;  %p994_p12 = scmp.lt.u32.totalorder %s990_s24, %s1308_s9 }
 0x31f   :  { %p996_p13 = pnand %p994_p12, %p991_p11 }
 0x321   :  { %999 = shalt.err (!%p996_p13)
}
 0x322   :  { %596 = dma.vmem_to_hbm [thread:$0]  %s591_s23, 512, %s1308_s9, [#allocation12], %s1012_s21, %s1012_s21, %s1013_s22  }
 0x323   :  { %1006 = dma.done.wait [#allocation4], 256  }
 0x324   :  { %1007 = vsyncadd [#allocation4], 4294967040 }
 0x325   :  { %1008 = dma.done.wait [#allocation12], 768  }
 0x326   :  { %1009 = vsyncadd [#allocation12], 4294966528 }
 0x327   :  { %606 = vsyncpa [#allocation3], 1 }
 0x328   :  { %607 = vsyncpa [#allocation6], 1 }
 0x329   :  { %608 = vsyncpa [#allocation9], 1 }
 0x32a   :  { %609 = vsyncpa [#allocation4], 1 }
 0x32b   :  { %610 = vsyncpa [#allocation12], 1 }

</bundles_post_ra>
